<compile_context>
chip_gen: v7x
topology: tpu7x:2x2x1
jax: 0.10.0
libtpu: 0.0.40
codegen_flags: <defaults>
</compile_context>

<pallas_src>
import math
import functools

import jax
import jax.numpy as jnp
from jax.experimental import pallas as pl
from jax.experimental.pallas import tpu as pltpu


D_IN = 32 * 32 * 3   # 3072
H = 128
N_OUT = 10
N_OUT_PAD = 128      # lane-dense padded output width


def _round_up(x: int, m: int) -> int:
    return ((x + m - 1) // m) * m


def make_mlp_kernel(branch_num: int):
    def mlp_kernel(x_ref, w0_ref, b0_ref, ws0_ref, bs0_ref,
                   w1_ref, b1_ref, ws1_ref, bs1_ref,
                   wl_ref, bl_ref, out_ref):
        # ---- layer0 + ReLU --------------------------------------------------
        h0 = jnp.dot(x_ref[...], w0_ref[...],
                     preferred_element_type=jnp.float32) + b0_ref[...]
        h0 = jnp.maximum(h0, 0.0)                                   # (TB, 128)

        # ---- branch expansion 0 + ReLU + layer1 (single K=branch*128 dot) ---
        # relu(concat_i(h0*ws0[i]+bs0[i])) is branch-major along the last dim,
        # matching the reference permute+reshape ordering. Concatenating
        # 128-wide pieces keeps the lane layout aligned.
        z0 = jnp.concatenate(
            [jnp.maximum(h0 * ws0_ref[i, :] + bs0_ref[i, :], 0.0)
             for i in range(branch_num)], axis=-1)          # (TB, branch*128)
        h1 = jnp.dot(z0, w1_ref[...],
                     preferred_element_type=jnp.float32) + b1_ref[...]
        h1 = jnp.maximum(h1, 0.0)                                   # (TB, 128)

        # ---- branch expansion 1 + ReLU + layer_last (lane-dense, padded) ----
        z1 = jnp.concatenate(
            [jnp.maximum(h1 * ws1_ref[i, :] + bs1_ref[i, :], 0.0)
             for i in range(branch_num)], axis=-1)          # (TB, branch*128)
        out_ref[...] = jnp.dot(z1, wl_ref[...],
                               preferred_element_type=jnp.float32) + bl_ref[...]

    return mlp_kernel


def mlp_forward(x, params, branch_num: int, *, tb: int = 256):
    """x: (B, 3, 32, 32) float32 (NCHW).  Returns (B, 10) float32."""
    B = x.shape[0]
    x_flat = x.reshape(B, -1).astype(jnp.float32)                  # (B, 3072)

    # Batch tile: multiple of 8 (sublane), capped so double-buffered x tiles
    # stay well inside the v7x 32 MiB scoped-VMEM default (256*3072*4*2 = 6 MiB
    # of x buffers + ~1.5 MiB resident w0).
    TB = min(tb, _round_up(B, 8))
    Bp = _round_up(B, TB)
    if Bp != B:
        x_flat = jnp.pad(x_flat, ((0, Bp - B), (0, 0)))

    K = branch_num * 128

    # Lane-dense final layer: zero-pad out columns 10..127 (sliced off below).
    wl_pad = jnp.pad(params["wl"], ((0, 0), (0, N_OUT_PAD - N_OUT)))
    bl_pad = jnp.pad(params["bl"], ((0, 0), (0, N_OUT_PAD - N_OUT)))

    args = (x_flat,
            params["w0"], params["b0"], params["ws0"], params["bs0"],
            params["w1"], params["b1"], params["ws1"], params["bs1"],
            wl_pad, bl_pad)

    # x tile marches over the batch; every weight/bias gets a constant
    # index_map so it stays resident in VMEM across grid steps.
    const2d = lambda i: (0, 0)
    in_specs = [
        pl.BlockSpec((TB, D_IN), lambda i: (i, 0)),          # x
        pl.BlockSpec((D_IN, H), const2d),                    # w0
        pl.BlockSpec((1, H), const2d),                       # b0
        pl.BlockSpec((branch_num, H), const2d),              # ws0
        pl.BlockSpec((branch_num, H), const2d),              # bs0
        pl.BlockSpec((K, H), const2d),                       # w1
        pl.BlockSpec((1, H), const2d),                       # b1
        pl.BlockSpec((branch_num, H), const2d),              # ws1
        pl.BlockSpec((branch_num, H), const2d),              # bs1
        pl.BlockSpec((K, N_OUT_PAD), const2d),               # wl (padded)
        pl.BlockSpec((1, N_OUT_PAD), const2d),               # bl (padded)
    ]
    out_spec = pl.BlockSpec((TB, N_OUT_PAD), lambda i: (i, 0))

    flops = 2 * Bp * (D_IN * H + K * H + K * N_OUT_PAD) + 6 * Bp * branch_num * H
    bytes_accessed = 4 * (Bp * D_IN + D_IN * H + 2 * K * H + K * N_OUT_PAD
                          + 4 * branch_num * H + 2 * H + 2 * N_OUT_PAD
                          + Bp * N_OUT_PAD)

    out_padded = pl.pallas_call(
        make_mlp_kernel(branch_num),
        out_shape=jax.ShapeDtypeStruct((Bp, N_OUT_PAD), jnp.float32),
        grid_spec=pltpu.PrefetchScalarGridSpec(
            num_scalar_prefetch=0,
            grid=(Bp // TB,),
            in_specs=in_specs,
            out_specs=out_spec,
        ),
        compiler_params=pltpu.CompilerParams(
            dimension_semantics=("parallel",),
        ),
        cost_estimate=pl.CostEstimate(
            flops=flops, transcendentals=0, bytes_accessed=bytes_accessed),
    )(*args)

    # Slice away batch padding and the zero-padded output columns.
    return out_padded[:B, :N_OUT]


def init_params(key, branch_num: int):
    """Deterministic parameter init (kaiming-uniform-ish bounds)."""
    ks = jax.random.split(key, 11)

    def unif(k, shape, fan_in):
        bound = 1.0 / math.sqrt(fan_in)
        return jax.random.uniform(k, shape, jnp.float32, -bound, bound)

    return {
        # Linear weights stored transposed: (in, out)
        "w0":  unif(ks[0], (D_IN, H), D_IN),
        "b0":  unif(ks[1], (1, H), D_IN),
        "ws0": unif(ks[2], (branch_num, H), branch_num),
        "bs0": unif(ks[3], (branch_num, H), branch_num),
        "w1":  unif(ks[4], (branch_num * H, H), branch_num * H),
        "b1":  unif(ks[5], (1, H), branch_num * H),
        "ws1": unif(ks[6], (branch_num, H), branch_num),
        "bs1": unif(ks[7], (branch_num, H), branch_num),
        "wl":  unif(ks[8], (branch_num * H, N_OUT), branch_num * H),
        "bl":  unif(ks[9], (1, N_OUT), branch_num * H),
    }


def mlp_reference(x, params, branch_num: int):
    """Pure-JAX reference mirroring the PyTorch forward exactly."""
    B = x.shape[0]
    h = x.reshape(B, -1)
    h = jnp.maximum(h @ params["w0"] + params["b0"], 0.0)          # (B,128)
    # branch expand 0: stack -> (B,128,branch) -> permute -> (B,branch,128)
    branches = jnp.stack([h * params["ws0"][i] + params["bs0"][i]
                          for i in range(branch_num)], axis=2)
    h = jnp.transpose(branches, (0, 2, 1)).reshape(B, branch_num * 128)
    h = jnp.maximum(h, 0.0)
    h = jnp.maximum(h @ params["w1"] + params["b1"], 0.0)          # (B,128)
    branches = jnp.stack([h * params["ws1"][i] + params["bs1"][i]
                          for i in range(branch_num)], axis=2)
    h = jnp.transpose(branches, (0, 2, 1)).reshape(B, branch_num * 128)
    h = jnp.maximum(h, 0.0)
    return h @ params["wl"] + params["bl"]                         # (B,10)


if __name__ == "__main__":
    branch_num = 2
    B = 8

    key = jax.random.PRNGKey(0)
    k_x, k_p = jax.random.split(key)
    x = jax.random.normal(k_x, (B, 3, 32, 32), jnp.float32)        # NCHW
    params = init_params(k_p, branch_num)

    # TODO(synk): for genuinely tiny batches (B~8) the kernel is weight-DMA
    # bound; amortize the w0 load by batching multiple forward calls together.
    out = mlp_forward(x, params, branch_num)
    out = jax.block_until_ready(out)

    ref = mlp_reference(x, params, branch_num)
    assert out.shape == (B, 10)
    assert jnp.allclose(out, ref, atol=1e-4, rtol=1e-4), \
        f"max err {jnp.max(jnp.abs(out - ref))}"

    print("KERNEL_OK")
</pallas_src>

<mosaic_0001>
module attributes {stable_mosaic.version = 11 : i64} {
  func.func @mlp_kernel(%arg0: i32, %arg1: memref<8x3072xf32, #tpu.memory_space<vmem>>, %arg2: memref<3072x128xf32, #tpu.memory_space<vmem>>, %arg3: memref<1x128xf32, #tpu.memory_space<vmem>>, %arg4: memref<2x128xf32, #tpu.memory_space<vmem>>, %arg5: memref<2x128xf32, #tpu.memory_space<vmem>>, %arg6: memref<256x128xf32, #tpu.memory_space<vmem>>, %arg7: memref<1x128xf32, #tpu.memory_space<vmem>>, %arg8: memref<2x128xf32, #tpu.memory_space<vmem>>, %arg9: memref<2x128xf32, #tpu.memory_space<vmem>>, %arg10: memref<256x128xf32, #tpu.memory_space<vmem>>, %arg11: memref<1x128xf32, #tpu.memory_space<vmem>>, %arg12: memref<8x128xf32, #tpu.memory_space<vmem>>) attributes {dimension_semantics = [#tpu.dimension_semantics<parallel>], iteration_bounds = array<i64: 1>, scalar_prefetch = 0 : i64, scratch_operands = 0 : i64, tpu.core_type = #tpu.core_type<tc>, window_params = [{transform_indices = @transform_0, window_bounds = array<i64: 8, 3072>}, {pipeline_mode = #tpu.pipeline_mode<synchronous>, transform_indices = @transform_1, window_bounds = array<i64: 3072, 128>}, {pipeline_mode = #tpu.pipeline_mode<synchronous>, transform_indices = @transform_2, window_bounds = array<i64: 1, 128>}, {pipeline_mode = #tpu.pipeline_mode<synchronous>, transform_indices = @transform_3, window_bounds = array<i64: 2, 128>}, {pipeline_mode = #tpu.pipeline_mode<synchronous>, transform_indices = @transform_4, window_bounds = array<i64: 2, 128>}, {pipeline_mode = #tpu.pipeline_mode<synchronous>, transform_indices = @transform_5, window_bounds = array<i64: 256, 128>}, {pipeline_mode = #tpu.pipeline_mode<synchronous>, transform_indices = @transform_6, window_bounds = array<i64: 1, 128>}, {pipeline_mode = #tpu.pipeline_mode<synchronous>, transform_indices = @transform_7, window_bounds = array<i64: 2, 128>}, {pipeline_mode = #tpu.pipeline_mode<synchronous>, transform_indices = @transform_8, window_bounds = array<i64: 2, 128>}, {pipeline_mode = #tpu.pipeline_mode<synchronous>, transform_indices = @transform_9, window_bounds = array<i64: 256, 128>}, {pipeline_mode = #tpu.pipeline_mode<synchronous>, transform_indices = @transform_10, window_bounds = array<i64: 1, 128>}, {transform_indices = @transform_11, window_bounds = array<i64: 8, 128>}]} {
    %c0 = arith.constant 0 : index
    %c0_0 = arith.constant 0 : index
    %0 = vector.load %arg1[%c0, %c0_0] : memref<8x3072xf32, #tpu.memory_space<vmem>>, vector<8x3072xf32>
    %c0_1 = arith.constant 0 : index
    %c0_2 = arith.constant 0 : index
    %1 = vector.load %arg2[%c0_1, %c0_2] : memref<3072x128xf32, #tpu.memory_space<vmem>>, vector<3072x128xf32>
    %cst = arith.constant dense<0.000000e+00> : vector<8x128xf32>
    %2 = tpu.matmul %0, %1, %cst {dimension_numbers = #tpu.dot_dimension_numbers<[1], [0], [0], [1], [0, 0, 1, 1], [], []>} : vector<8x3072xf32>, vector<3072x128xf32>, vector<8x128xf32> -> vector<8x128xf32>
    %c0_3 = arith.constant 0 : index
    %c0_4 = arith.constant 0 : index
    %3 = vector.load %arg3[%c0_3, %c0_4] : memref<1x128xf32, #tpu.memory_space<vmem>>, vector<1x128xf32>
    %4 = vector.broadcast %3 : vector<1x128xf32> to vector<8x128xf32>
    %5 = arith.addf %2, %4 : vector<8x128xf32>
    %cst_5 = arith.constant 0.000000e+00 : f32
    %6 = vector.broadcast %cst_5 : f32 to vector<8x128xf32>
    %7 = arith.maximumf %5, %6 : vector<8x128xf32>
    %c0_6 = arith.constant 0 : index
    %c0_7 = arith.constant 0 : index
    %8 = vector.load %arg4[%c0_6, %c0_7] : memref<2x128xf32, #tpu.memory_space<vmem>>, vector<1x128xf32>
    %9 = vector.shape_cast %8 : vector<1x128xf32> to vector<128xf32>
    %10 = vector.shape_cast %9 : vector<128xf32> to vector<1x128xf32>
    %11 = vector.broadcast %10 : vector<1x128xf32> to vector<8x128xf32>
    %12 = arith.mulf %7, %11 : vector<8x128xf32>
    %c0_8 = arith.constant 0 : index
    %c0_9 = arith.constant 0 : index
    %13 = vector.load %arg5[%c0_8, %c0_9] : memref<2x128xf32, #tpu.memory_space<vmem>>, vector<1x128xf32>
    %14 = vector.shape_cast %13 : vector<1x128xf32> to vector<128xf32>
    %15 = vector.shape_cast %14 : vector<128xf32> to vector<1x128xf32>
    %16 = vector.broadcast %15 : vector<1x128xf32> to vector<8x128xf32>
    %17 = arith.addf %12, %16 : vector<8x128xf32>
    %cst_10 = arith.constant 0.000000e+00 : f32
    %18 = vector.broadcast %cst_10 : f32 to vector<8x128xf32>
    %19 = arith.maximumf %17, %18 : vector<8x128xf32>
    %c1 = arith.constant 1 : index
    %c0_11 = arith.constant 0 : index
    %20 = vector.load %arg4[%c1, %c0_11] : memref<2x128xf32, #tpu.memory_space<vmem>>, vector<1x128xf32>
    %21 = vector.shape_cast %20 : vector<1x128xf32> to vector<128xf32>
    %22 = vector.shape_cast %21 : vector<128xf32> to vector<1x128xf32>
    %23 = vector.broadcast %22 : vector<1x128xf32> to vector<8x128xf32>
    %24 = arith.mulf %7, %23 : vector<8x128xf32>
    %c1_12 = arith.constant 1 : index
    %c0_13 = arith.constant 0 : index
    %25 = vector.load %arg5[%c1_12, %c0_13] : memref<2x128xf32, #tpu.memory_space<vmem>>, vector<1x128xf32>
    %26 = vector.shape_cast %25 : vector<1x128xf32> to vector<128xf32>
    %27 = vector.shape_cast %26 : vector<128xf32> to vector<1x128xf32>
    %28 = vector.broadcast %27 : vector<1x128xf32> to vector<8x128xf32>
    %29 = arith.addf %24, %28 : vector<8x128xf32>
    %cst_14 = arith.constant 0.000000e+00 : f32
    %30 = vector.broadcast %cst_14 : f32 to vector<8x128xf32>
    %31 = arith.maximumf %29, %30 : vector<8x128xf32>
    %32 = tpu.concatenate %19, %31 in 1 : vector<8x128xf32>, vector<8x128xf32> -> vector<8x256xf32>
    %c0_15 = arith.constant 0 : index
    %c0_16 = arith.constant 0 : index
    %33 = vector.load %arg6[%c0_15, %c0_16] : memref<256x128xf32, #tpu.memory_space<vmem>>, vector<256x128xf32>
    %cst_17 = arith.constant dense<0.000000e+00> : vector<8x128xf32>
    %34 = tpu.matmul %32, %33, %cst_17 {dimension_numbers = #tpu.dot_dimension_numbers<[1], [0], [0], [1], [0, 0, 1, 1], [], []>} : vector<8x256xf32>, vector<256x128xf32>, vector<8x128xf32> -> vector<8x128xf32>
    %c0_18 = arith.constant 0 : index
    %c0_19 = arith.constant 0 : index
    %35 = vector.load %arg7[%c0_18, %c0_19] : memref<1x128xf32, #tpu.memory_space<vmem>>, vector<1x128xf32>
    %36 = vector.broadcast %35 : vector<1x128xf32> to vector<8x128xf32>
    %37 = arith.addf %34, %36 : vector<8x128xf32>
    %cst_20 = arith.constant 0.000000e+00 : f32
    %38 = vector.broadcast %cst_20 : f32 to vector<8x128xf32>
    %39 = arith.maximumf %37, %38 : vector<8x128xf32>
    %c0_21 = arith.constant 0 : index
    %c0_22 = arith.constant 0 : index
    %40 = vector.load %arg8[%c0_21, %c0_22] : memref<2x128xf32, #tpu.memory_space<vmem>>, vector<1x128xf32>
    %41 = vector.shape_cast %40 : vector<1x128xf32> to vector<128xf32>
    %42 = vector.shape_cast %41 : vector<128xf32> to vector<1x128xf32>
    %43 = vector.broadcast %42 : vector<1x128xf32> to vector<8x128xf32>
    %44 = arith.mulf %39, %43 : vector<8x128xf32>
    %c0_23 = arith.constant 0 : index
    %c0_24 = arith.constant 0 : index
    %45 = vector.load %arg9[%c0_23, %c0_24] : memref<2x128xf32, #tpu.memory_space<vmem>>, vector<1x128xf32>
    %46 = vector.shape_cast %45 : vector<1x128xf32> to vector<128xf32>
    %47 = vector.shape_cast %46 : vector<128xf32> to vector<1x128xf32>
    %48 = vector.broadcast %47 : vector<1x128xf32> to vector<8x128xf32>
    %49 = arith.addf %44, %48 : vector<8x128xf32>
    %cst_25 = arith.constant 0.000000e+00 : f32
    %50 = vector.broadcast %cst_25 : f32 to vector<8x128xf32>
    %51 = arith.maximumf %49, %50 : vector<8x128xf32>
    %c1_26 = arith.constant 1 : index
    %c0_27 = arith.constant 0 : index
    %52 = vector.load %arg8[%c1_26, %c0_27] : memref<2x128xf32, #tpu.memory_space<vmem>>, vector<1x128xf32>
    %53 = vector.shape_cast %52 : vector<1x128xf32> to vector<128xf32>
    %54 = vector.shape_cast %53 : vector<128xf32> to vector<1x128xf32>
    %55 = vector.broadcast %54 : vector<1x128xf32> to vector<8x128xf32>
    %56 = arith.mulf %39, %55 : vector<8x128xf32>
    %c1_28 = arith.constant 1 : index
    %c0_29 = arith.constant 0 : index
    %57 = vector.load %arg9[%c1_28, %c0_29] : memref<2x128xf32, #tpu.memory_space<vmem>>, vector<1x128xf32>
    %58 = vector.shape_cast %57 : vector<1x128xf32> to vector<128xf32>
    %59 = vector.shape_cast %58 : vector<128xf32> to vector<1x128xf32>
    %60 = vector.broadcast %59 : vector<1x128xf32> to vector<8x128xf32>
    %61 = arith.addf %56, %60 : vector<8x128xf32>
    %cst_30 = arith.constant 0.000000e+00 : f32
    %62 = vector.broadcast %cst_30 : f32 to vector<8x128xf32>
    %63 = arith.maximumf %61, %62 : vector<8x128xf32>
    %64 = tpu.concatenate %51, %63 in 1 : vector<8x128xf32>, vector<8x128xf32> -> vector<8x256xf32>
    %c0_31 = arith.constant 0 : index
    %c0_32 = arith.constant 0 : index
    %65 = vector.load %arg10[%c0_31, %c0_32] : memref<256x128xf32, #tpu.memory_space<vmem>>, vector<256x128xf32>
    %cst_33 = arith.constant dense<0.000000e+00> : vector<8x128xf32>
    %66 = tpu.matmul %64, %65, %cst_33 {dimension_numbers = #tpu.dot_dimension_numbers<[1], [0], [0], [1], [0, 0, 1, 1], [], []>} : vector<8x256xf32>, vector<256x128xf32>, vector<8x128xf32> -> vector<8x128xf32>
    %c0_34 = arith.constant 0 : index
    %c0_35 = arith.constant 0 : index
    %67 = vector.load %arg11[%c0_34, %c0_35] : memref<1x128xf32, #tpu.memory_space<vmem>>, vector<1x128xf32>
    %68 = vector.broadcast %67 : vector<1x128xf32> to vector<8x128xf32>
    %69 = arith.addf %66, %68 : vector<8x128xf32>
    %c0_36 = arith.constant 0 : index
    %c0_37 = arith.constant 0 : index
    %70 = vector.load %arg12[%c0_36, %c0_37] : memref<8x128xf32, #tpu.memory_space<vmem>>, vector<8x128xf32>
    tpu.vector_store %arg12[%c0_36, %c0_37], %69 {strides = array<i32>} : memref<8x128xf32, #tpu.memory_space<vmem>>, vector<8x128xf32>,
    return
  }
  func.func @transform_0(%arg0: i32) -> (i32, i32) {
    %c0_i32 = arith.constant 0 : i32
    %c0_i32_0 = arith.constant 0 : i32
    return %arg0, %c0_i32 : i32, i32
  }
  func.func @transform_1(%arg0: i32) -> (i32, i32) {
    %c0_i32 = arith.constant 0 : i32
    %c0_i32_0 = arith.constant 0 : i32
    %c0_i32_1 = arith.constant 0 : i32
    return %c0_i32, %c0_i32_0 : i32, i32
  }
  func.func @transform_2(%arg0: i32) -> (i32, i32) {
    %c0_i32 = arith.constant 0 : i32
    %c0_i32_0 = arith.constant 0 : i32
    %c0_i32_1 = arith.constant 0 : i32
    return %c0_i32, %c0_i32_0 : i32, i32
  }
  func.func @transform_3(%arg0: i32) -> (i32, i32) {
    %c0_i32 = arith.constant 0 : i32
    %c0_i32_0 = arith.constant 0 : i32
    %c0_i32_1 = arith.constant 0 : i32
    return %c0_i32, %c0_i32_0 : i32, i32
  }
  func.func @transform_4(%arg0: i32) -> (i32, i32) {
    %c0_i32 = arith.constant 0 : i32
    %c0_i32_0 = arith.constant 0 : i32
    %c0_i32_1 = arith.constant 0 : i32
    return %c0_i32, %c0_i32_0 : i32, i32
  }
  func.func @transform_5(%arg0: i32) -> (i32, i32) {
    %c0_i32 = arith.constant 0 : i32
    %c0_i32_0 = arith.constant 0 : i32
    %c0_i32_1 = arith.constant 0 : i32
    return %c0_i32, %c0_i32_0 : i32, i32
  }
  func.func @transform_6(%arg0: i32) -> (i32, i32) {
    %c0_i32 = arith.constant 0 : i32
    %c0_i32_0 = arith.constant 0 : i32
    %c0_i32_1 = arith.constant 0 : i32
    return %c0_i32, %c0_i32_0 : i32, i32
  }
  func.func @transform_7(%arg0: i32) -> (i32, i32) {
    %c0_i32 = arith.constant 0 : i32
    %c0_i32_0 = arith.constant 0 : i32
    %c0_i32_1 = arith.constant 0 : i32
    return %c0_i32, %c0_i32_0 : i32, i32
  }
  func.func @transform_8(%arg0: i32) -> (i32, i32) {
    %c0_i32 = arith.constant 0 : i32
    %c0_i32_0 = arith.constant 0 : i32
    %c0_i32_1 = arith.constant 0 : i32
    return %c0_i32, %c0_i32_0 : i32, i32
  }
  func.func @transform_9(%arg0: i32) -> (i32, i32) {
    %c0_i32 = arith.constant 0 : i32
    %c0_i32_0 = arith.constant 0 : i32
    %c0_i32_1 = arith.constant 0 : i32
    return %c0_i32, %c0_i32_0 : i32, i32
  }
  func.func @transform_10(%arg0: i32) -> (i32, i32) {
    %c0_i32 = arith.constant 0 : i32
    %c0_i32_0 = arith.constant 0 : i32
    %c0_i32_1 = arith.constant 0 : i32
    return %c0_i32, %c0_i32_0 : i32, i32
  }
  func.func @transform_11(%arg0: i32) -> (i32, i32) {
    %c0_i32 = arith.constant 0 : i32
    %c0_i32_0 = arith.constant 0 : i32
    return %arg0, %c0_i32 : i32, i32
  }
}

</mosaic_0001>

<bundles_post_ra>
// kernel: tpu_custom_call.1
= control target key start
LH: loop header
LB: loop body
LE: loop exit
PB: predicated region body
PF: predicated region fallthrough
CT: control target
= control target key end

     0   :  { %16 = vsyncpa [#allocation3], 0  ;;  %s3188_s0 = inlined_call_operand.hbm [shape: f32[8,3072], index: 0, kind: input, shape index: {}]   ;;  %s3189_s1 = inlined_call_operand.hbm [shape: f32[3072,128], index: 1, kind: input, shape index: {}]   ;;  %s3190_s2 = inlined_call_operand.hbm [shape: f32[1,128], index: 2, kind: input, shape index: {}]   ;;  %s3191_s3 = inlined_call_operand.hbm [shape: f32[2,128], index: 3, kind: input, shape index: {}]   ;;  %s3192_s4 = inlined_call_operand.hbm [shape: f32[2,128], index: 4, kind: input, shape index: {}]   ;;  %s3193_s5 = inlined_call_operand.hbm [shape: f32[256,128], index: 5, kind: input, shape index: {}]   ;;  %s3194_s6 = inlined_call_operand.hbm [shape: f32[1,128], index: 6, kind: input, shape index: {}]   ;;  %s3195_s7 = inlined_call_operand.hbm [shape: f32[2,128], index: 7, kind: input, shape index: {}]   ;;  %s3196_s8 = inlined_call_operand.hbm [shape: f32[2,128], index: 8, kind: input, shape index: {}]   ;;  %s3197_s9 = inlined_call_operand.hbm [shape: f32[256,128], index: 9, kind: input, shape index: {}]   ;;  %s3198_s10 = inlined_call_operand.hbm [shape: f32[1,128], index: 10, kind: input, shape index: {}]   ;;  %s3199_s11 = inlined_call_operand.hbm [shape: f32[8,128], index: 11, kind: output, shape index: {}]  }
   0x1   :  { %17 = vsyncpa [#allocation6], 0 }
   0x2   :  { %18 = vsyncpa [#allocation9], 0 }
   0x3   :  { %19 = vsyncpa [#allocation12], 0 }
   0x4   :  { %20 = vsyncpa [#allocation15], 0 }
   0x5   :  { %21 = vsyncpa [#allocation18], 0 }
   0x6   :  { %22 = vsyncpa [#allocation4], 0  ;;  %s2961_s17 = smov [#allocation5]   ;;  %s2683_s21 = scalar_lea.hbm %s3189_s1, 49152 }
   0x7   :  { %s38_s18 = sshll.u32 %s2961_s17, 4  ;;  %p2684_p0 = scmp.ne.s32.totalorder %s3189_s1, %s2683_s21  ;;  %s39_s18 = int_to_ptr.vmem [resolvable:$true] %s38_s18 }
   0x8   :  { %p2687_p1 = scmp.lt.u32.totalorder %s2683_s21, %s3189_s1 }
   0xa   :  { %p2689_p2 = pnand %p2687_p1, %p2684_p0 }
   0xc   :  { %2692 = shalt.err (!%p2689_p2)
}
   0xd   :  { %s2693_s26 = scalar_lea.vmem %s39_s18, 49152  ;;  %p2698_p4 = scmp.lt.s32.totalorder %s39_s18, %s39_s18 }
   0xe   :  { %p2694_p3 = scmp.ne.s32.totalorder %s39_s18, %s2693_s26  ;;  %p2699_p5 = scmp.lt.s32.totalorder %s2693_s26, %s2693_s26 }
  0x10   :  { %p2700_p6 = por %p2699_p5, %p2698_p4 }
  0x12   :  { %p2701_p7 = pnand %p2700_p6, %p2694_p3 }
  0x14   :  { %2704 = shalt.err (!%p2701_p7)
}
  0x15   :  { %s2962_s27 = smov 128   ;;  %s2963_s28 = smov 8  }
  0x16   :  { %44 = dma.hbm_to_vmem [thread:$0]  %s3189_s1, 49152, %s39_s18, [#allocation6], %s2962_s27, %s2962_s27, %s2963_s28  }
  0x17   :  { %s2964_s12 = smov [#allocation8]   ;;  %s2965_s14 = smov [#allocation11]  }
  0x18   :  { %s61_s13 = sshll.u32 %s2964_s12, 4  ;;  %s80_s15 = sshll.u32 %s2965_s14, 4  ;;  %s62_s13 = int_to_ptr.vmem [resolvable:$true] %s61_s13  ;;  %s81_s15 = int_to_ptr.vmem [resolvable:$true] %s80_s15 }
  0x19   :  { %s2705_s19 = scalar_lea.hbm %s3191_s3, 32 }
  0x1a   :  { %p2706_p8 = scmp.ne.s32.totalorder %s3191_s3, %s2705_s19  ;;  %p2709_p9 = scmp.lt.u32.totalorder %s2705_s19, %s3191_s3 }
  0x1c   :  { %p2711_p10 = pnand %p2709_p9, %p2706_p8 }
  0x1e   :  { %2714 = shalt.err (!%p2711_p10)
}
  0x1f   :  { %s2715_s1 = scalar_lea.vmem %s62_s13, 32  ;;  %p2720_p12 = scmp.lt.s32.totalorder %s62_s13, %s62_s13 }
  0x20   :  { %p2716_p11 = scmp.ne.s32.totalorder %s62_s13, %s2715_s1  ;;  %p2721_p13 = scmp.lt.s32.totalorder %s2715_s1, %s2715_s1 }
  0x22   :  { %p2722_p0 = por %p2721_p13, %p2720_p12 }
  0x24   :  { %p2723_p1 = pnand %p2722_p0, %p2716_p11 }
  0x26   :  { %2726 = shalt.err (!%p2723_p1)
}
  0x27   :  { %64 = dma.hbm_to_vmem [thread:$0]  %s3191_s3, 32, %s62_s13, [#allocation9]  }
  0x28   :  { %s2727_s29 = scalar_lea.hbm %s3193_s5, 4096 }
  0x29   :  { %p2728_p2 = scmp.ne.s32.totalorder %s3193_s5, %s2727_s29  ;;  %p2731_p3 = scmp.lt.u32.totalorder %s2727_s29, %s3193_s5 }
  0x2b   :  { %p2733_p4 = pnand %p2731_p3, %p2728_p2 }
  0x2d   :  { %2736 = shalt.err (!%p2733_p4)
}
  0x2e   :  { %s2737_s17 = scalar_lea.vmem %s81_s15, 4096  ;;  %p2742_p6 = scmp.lt.s32.totalorder %s81_s15, %s81_s15 }
  0x2f   :  { %p2738_p5 = scmp.ne.s32.totalorder %s81_s15, %s2737_s17  ;;  %p2743_p7 = scmp.lt.s32.totalorder %s2737_s17, %s2737_s17 }
  0x31   :  { %p2744_p8 = por %p2743_p7, %p2742_p6 }
  0x33   :  { %p2745_p9 = pnand %p2744_p8, %p2738_p5 }
  0x35   :  { %2748 = shalt.err (!%p2745_p9)
}
  0x36   :  { %86 = dma.hbm_to_vmem [thread:$0]  %s3193_s5, 4096, %s81_s15, [#allocation12], %s2962_s27, %s2962_s27, %s2963_s28  }
  0x37   :  { %s2966_s19 = smov [#allocation14]   ;;  %s2967_s21 = smov [#allocation17]  }
  0x38   :  { %s103_s20 = sshll.u32 %s2966_s19, 4  ;;  %s122_s22 = sshll.u32 %s2967_s21, 4  ;;  %s104_s20 = int_to_ptr.vmem [resolvable:$true] %s103_s20  ;;  %s123_s22 = int_to_ptr.vmem [resolvable:$true] %s122_s22 }
  0x39   :  { %s2749_s18 = scalar_lea.hbm %s3195_s7, 32 }
  0x3a   :  { %p2750_p10 = scmp.ne.s32.totalorder %s3195_s7, %s2749_s18  ;;  %p2753_p11 = scmp.lt.u32.totalorder %s2749_s18, %s3195_s7 }
  0x3c   :  { %p2755_p12 = pnand %p2753_p11, %p2750_p10 }
  0x3e   :  { %2758 = shalt.err (!%p2755_p12)
}
  0x3f   :  { %s2759_s5 = scalar_lea.vmem %s104_s20, 32  ;;  %p2764_p0 = scmp.lt.s32.totalorder %s104_s20, %s104_s20 }
  0x40   :  { %p2760_p13 = scmp.ne.s32.totalorder %s104_s20, %s2759_s5  ;;  %p2765_p1 = scmp.lt.s32.totalorder %s2759_s5, %s2759_s5 }
  0x42   :  { %p2766_p2 = por %p2765_p1, %p2764_p0 }
  0x44   :  { %p2767_p3 = pnand %p2766_p2, %p2760_p13 }
  0x46   :  { %2770 = shalt.err (!%p2767_p3)
}
  0x47   :  { %106 = dma.hbm_to_vmem [thread:$0]  %s3195_s7, 32, %s104_s20, [#allocation15]  }
  0x48   :  { %s2771_s16 = scalar_lea.hbm %s3197_s9, 4096 }
  0x49   :  { %p2772_p4 = scmp.ne.s32.totalorder %s3197_s9, %s2771_s16  ;;  %p2775_p5 = scmp.lt.u32.totalorder %s2771_s16, %s3197_s9 }
  0x4b   :  { %p2777_p6 = pnand %p2775_p5, %p2772_p4 }
  0x4d   :  { %2780 = shalt.err (!%p2777_p6)
}
  0x4e   :  { %s2781_s21 = scalar_lea.vmem %s123_s22, 4096  ;;  %p2786_p8 = scmp.lt.s32.totalorder %s123_s22, %s123_s22 }
  0x4f   :  { %p2782_p7 = scmp.ne.s32.totalorder %s123_s22, %s2781_s21  ;;  %p2787_p9 = scmp.lt.s32.totalorder %s2781_s21, %s2781_s21 }
  0x51   :  { %p2788_p10 = por %p2787_p9, %p2786_p8 }
  0x53   :  { %p2789_p11 = pnand %p2788_p10, %p2782_p7 }
  0x55   :  { %2792 = shalt.err (!%p2789_p11)
}
  0x56   :  { %128 = dma.hbm_to_vmem [thread:$0]  %s3197_s9, 4096, %s123_s22, [#allocation18], %s2962_s27, %s2962_s27, %s2963_s28  }
  0x57   :  { %s2968_s23 = smov [#allocation2]   ;;  %s2969_s18 = smov [#allocation7]  }
  0x58   :  { %s29_s1 = sshll.u32 %s2968_s23, 4  ;;  %s51_s24 = sshll.u32 %s2969_s18, 4  ;;  %s30_s1 = int_to_ptr.vmem [resolvable:$true] %s29_s1  ;;  %s52_s24 = int_to_ptr.vmem [resolvable:$true] %s51_s24 }
  0x59   :  { %s2793_s29 = scalar_lea.hbm %s3188_s0, 3072 }
  0x5a   :  { %p2794_p12 = scmp.ne.s32.totalorder %s3188_s0, %s2793_s29  ;;  %p2797_p13 = scmp.lt.u32.totalorder %s2793_s29, %s3188_s0 }
  0x5c   :  { %p2799_p0 = pnand %p2797_p13, %p2794_p12 }
  0x5e   :  { %2802 = shalt.err (!%p2799_p0)
}
  0x5f   :  { %s2803_s9 = scalar_lea.vmem %s30_s1, 3072  ;;  %p2808_p2 = scmp.lt.s32.totalorder %s30_s1, %s30_s1 }
  0x60   :  { %p2804_p1 = scmp.ne.s32.totalorder %s30_s1, %s2803_s9  ;;  %p2809_p3 = scmp.lt.s32.totalorder %s2803_s9, %s2803_s9 }
  0x62   :  { %p2810_p4 = por %p2809_p3, %p2808_p2 }
  0x64   :  { %p2811_p5 = pnand %p2810_p4, %p2804_p1 }
  0x66   :  { %2814 = shalt.err (!%p2811_p5)
}
  0x67   :  { %32 = dma.hbm_to_vmem [thread:$0]  %s3188_s0, 3072, %s30_s1, [#allocation3]  }
  0x68   :  { %s2815_s16 = scalar_lea.hbm %s3190_s2, 16 }
  0x69   :  { %p2816_p6 = scmp.ne.s32.totalorder %s3190_s2, %s2815_s16  ;;  %p2819_p7 = scmp.lt.u32.totalorder %s2815_s16, %s3190_s2 }
  0x6b   :  { %p2821_p8 = pnand %p2819_p7, %p2816_p6 }
  0x6d   :  { %2824 = shalt.err (!%p2821_p8)
}
  0x6e   :  { %s2825_s21 = scalar_lea.vmem %s52_s24, 16  ;;  %s2829_s7 = scalar_lea.vmem %s52_s24, 32 }
  0x6f   :  { %p2826_p9 = scmp.ne.s32.totalorder %s52_s24, %s2825_s21  ;;  %p2830_p10 = scmp.lt.s32.totalorder %s52_s24, %s52_s24 }
  0x70   :  { %p2831_p11 = scmp.lt.s32.totalorder %s2829_s7, %s2825_s21 }
  0x72   :  { %p2832_p12 = por %p2831_p11, %p2830_p10 }
  0x74   :  { %p2833_p13 = pnand %p2832_p12, %p2826_p9 }
  0x76   :  { %2836 = shalt.err (!%p2833_p13)
}
  0x77   :  { %54 = dma.hbm_to_vmem [thread:$0]  %s3190_s2, 16, %s52_s24, [#allocation6]  }
  0x78   :  { %s2970_s23 = smov [#allocation10]   ;;  %s2971_s18 = smov [#allocation13]  }
  0x79   :  { %s71_s1 = sshll.u32 %s2970_s23, 4  ;;  %s93_s25 = sshll.u32 %s2971_s18, 4  ;;  %s72_s1 = int_to_ptr.vmem [resolvable:$true] %s71_s1  ;;  %s94_s25 = int_to_ptr.vmem [resolvable:$true] %s93_s25 }
  0x7a   :  { %s2837_s5 = scalar_lea.hbm %s3192_s4, 32 }
  0x7b   :  { %p2838_p0 = scmp.ne.s32.totalorder %s3192_s4, %s2837_s5  ;;  %p2841_p1 = scmp.lt.u32.totalorder %s2837_s5, %s3192_s4 }
  0x7d   :  { %p2843_p2 = pnand %p2841_p1, %p2838_p0 }
  0x7f   :  { %2846 = shalt.err (!%p2843_p2)
}
  0x80   :  { %s2847_s2 = scalar_lea.vmem %s72_s1, 32  ;;  %p2852_p4 = scmp.lt.s32.totalorder %s72_s1, %s72_s1 }
  0x81   :  { %p2848_p3 = scmp.ne.s32.totalorder %s72_s1, %s2847_s2  ;;  %p2853_p5 = scmp.lt.s32.totalorder %s2847_s2, %s2847_s2 }
  0x83   :  { %p2854_p6 = por %p2853_p5, %p2852_p4 }
  0x85   :  { %p2855_p7 = pnand %p2854_p6, %p2848_p3 }
  0x87   :  { %2858 = shalt.err (!%p2855_p7)
}
  0x88   :  { %74 = dma.hbm_to_vmem [thread:$0]  %s3192_s4, 32, %s72_s1, [#allocation9]  }
  0x89   :  { %s2859_s14 = scalar_lea.hbm %s3194_s6, 16 }
  0x8a   :  { %p2860_p8 = scmp.ne.s32.totalorder %s3194_s6, %s2859_s14  ;;  %p2863_p9 = scmp.lt.u32.totalorder %s2859_s14, %s3194_s6 }
  0x8c   :  { %p2865_p10 = pnand %p2863_p9, %p2860_p8 }
  0x8e   :  { %2868 = shalt.err (!%p2865_p10)
}
  0x8f   :  { %s2869_s19 = scalar_lea.vmem %s94_s25, 16  ;;  %s2873_s21 = scalar_lea.vmem %s94_s25, 32 }
  0x90   :  { %p2870_p11 = scmp.ne.s32.totalorder %s94_s25, %s2869_s19  ;;  %p2874_p12 = scmp.lt.s32.totalorder %s94_s25, %s94_s25 }
  0x91   :  { %p2875_p13 = scmp.lt.s32.totalorder %s2873_s21, %s2869_s19 }
  0x93   :  { %p2876_p0 = por %p2875_p13, %p2874_p12 }
  0x95   :  { %p2877_p1 = pnand %p2876_p0, %p2870_p11 }
  0x97   :  { %2880 = shalt.err (!%p2877_p1)
}
  0x98   :  { %96 = dma.hbm_to_vmem [thread:$0]  %s3194_s6, 16, %s94_s25, [#allocation12]  }
  0x99   :  { %s2972_s0 = smov [#allocation16]   ;;  %s2973_s23 = smov [#allocation19]  }
  0x9a   :  { %s113_s20 = sshll.u32 %s2972_s0, 4  ;;  %s135_s1 = sshll.u32 %s2973_s23, 4  ;;  %s114_s20 = int_to_ptr.vmem [resolvable:$true] %s113_s20  ;;  %s136_s1 = int_to_ptr.vmem [resolvable:$true] %s135_s1 }
  0x9b   :  { %s2881_s29 = scalar_lea.hbm %s3196_s8, 32 }
  0x9c   :  { %p2882_p2 = scmp.ne.s32.totalorder %s3196_s8, %s2881_s29  ;;  %p2885_p3 = scmp.lt.u32.totalorder %s2881_s29, %s3196_s8 }
  0x9e   :  { %p2887_p4 = pnand %p2885_p3, %p2882_p2 }
  0xa0   :  { %2890 = shalt.err (!%p2887_p4)
}
  0xa1   :  { %s2891_s6 = scalar_lea.vmem %s114_s20, 32  ;;  %p2896_p6 = scmp.lt.s32.totalorder %s114_s20, %s114_s20 }
  0xa2   :  { %p2892_p5 = scmp.ne.s32.totalorder %s114_s20, %s2891_s6  ;;  %p2897_p7 = scmp.lt.s32.totalorder %s2891_s6, %s2891_s6 }
  0xa4   :  { %p2898_p8 = por %p2897_p7, %p2896_p6 }
  0xa6   :  { %p2899_p9 = pnand %p2898_p8, %p2892_p5 }
  0xa8   :  { %2902 = shalt.err (!%p2899_p9)
}
  0xa9   :  { %116 = dma.hbm_to_vmem [thread:$0]  %s3196_s8, 32, %s114_s20, [#allocation15]  }
  0xaa   :  { %s2903_s27 = scalar_lea.hbm %s3198_s10, 16 }
  0xab   :  { %p2904_p10 = scmp.ne.s32.totalorder %s3198_s10, %s2903_s27  ;;  %p2907_p11 = scmp.lt.u32.totalorder %s2903_s27, %s3198_s10 }
  0xad   :  { %p2909_p12 = pnand %p2907_p11, %p2904_p10 }
  0xaf   :  { %2912 = shalt.err (!%p2909_p12)
}
  0xb0   :  { %s2913_s17 = scalar_lea.vmem %s136_s1, 16  ;;  %s2917_s3 = scalar_lea.vmem %s136_s1, 32 }
  0xb1   :  { %p2914_p13 = scmp.ne.s32.totalorder %s136_s1, %s2913_s17  ;;  %p2918_p0 = scmp.lt.s32.totalorder %s136_s1, %s136_s1 }
  0xb2   :  { %p2919_p1 = scmp.lt.s32.totalorder %s2917_s3, %s2913_s17 }
  0xb4   :  { %p2920_p2 = por %p2919_p1, %p2918_p0 }
  0xb6   :  { %p2921_p3 = pnand %p2920_p2, %p2914_p13 }
  0xb8   :  { %2924 = shalt.err (!%p2921_p3)
}
  0xb9   :  { %138 = dma.hbm_to_vmem [thread:$0]  %s3198_s10, 16, %s136_s1, [#allocation18]  }
  0xba   :  { %2947 = dma.done.wait [#allocation3], 3072  }
  0xbb   :  { %2948 = vsyncadd [#allocation3], 4294964224 }
  0xbc   :  { %2949 = dma.done.wait [#allocation6], 49168  }
  0xbd   :  { %2950 = vsyncadd [#allocation6], 4294918128 }
  0xbe   :  { %2951 = dma.done.wait [#allocation9], 64  }
  0xbf   :  { %2952 = vsyncadd [#allocation9], 4294967232 }
  0xc0   :  { %2953 = dma.done.wait [#allocation12], 4112  }
  0xc1   :  { %2954 = vsyncadd [#allocation12], 4294963184 }
  0xc2   :  { %2955 = dma.done.wait [#allocation15], 64  }
  0xc3   :  { %2956 = vsyncadd [#allocation15], 4294967232 }
  0xc4   :  { %2957 = dma.done.wait [#allocation18], 4112  }
  0xc5   :  { %2958 = vsyncadd [#allocation18], 4294963184  ;;  %v212_v0 = vld [vmem:[#allocation5 + $0x80] sm:$0xff]  ;;  %v213_v1 = vld [vmem:[#allocation5 + $0x88] sm:$0xff]  ;;  %s2974_s10 = smov [#allocation20]  }
  0xc6   :  { %v196_v2 = vld [vmem:[#allocation5] sm:$0xff]  ;;  %v2221_v3 = vpack.c.bf16 %v213_v1, %v212_v0  ;;  %v197_v4 = vld [vmem:[#allocation5 + $0x8] sm:$0xff]  ;;  %v214_v11 = vld [vmem:[#allocation5 + $0x90] sm:$0xff]  ;;  %s1706_s19 = sshll.u32 %s2974_s10, 4  ;;  %s1707_s19 = int_to_ptr.vmem [resolvable:$true] %s1706_s19 }
  0xc7   :  { %v244_v5 = vld [vmem:[#allocation5 + $0x180] sm:$0xff]  ;;  %v245_v6 = vld [vmem:[#allocation5 + $0x188] sm:$0xff]  ;;  %v2223_v7 = vpack.c.bf16 %v197_v4, %v196_v2  ;;  %v215_v13 = vld [vmem:[#allocation5 + $0x98] sm:$0xff]  ;;  %s2925_s21 = scalar_lea.vmem %s1707_s19, 128  ;;  %p2930_p5 = scmp.lt.s32.totalorder %s1707_s19, %s1707_s19 }
  0xc8   :  { %v2253_v8 = vpack.c.bf16 %v245_v6, %v244_v5  ;;  %v228_v9 = vld [vmem:[#allocation5 + $0x100] sm:$0xff]  ;;  %v229_v10 = vld [vmem:[#allocation5 + $0x108] sm:$0xff]  ;;  %2222 = vmatprep.subr.bf16.mxu0 %v2221_v3  ;;  %v198_v14 = vld [vmem:[#allocation5 + $0x10] sm:$0xff]  ;;  %v2225_v16 = vpack.c.bf16 %v215_v13, %v214_v11  ;;  %p2926_p4 = scmp.ne.s32.totalorder %s1707_s19, %s2925_s21  ;;  %p2931_p6 = scmp.lt.s32.totalorder %s2925_s21, %s2925_s21 }
  0xc9   :  { %v2255_v12 = vpack.c.bf16 %v229_v10, %v228_v9  ;;  %v199_v15 = vld [vmem:[#allocation5 + $0x18] sm:$0xff]  ;;  %2224 = vmatpush3.bf16.msra.mxu0 %v2223_v7  ;;  %v246_v18 = vld [vmem:[#allocation5 + $0x190] sm:$0xff]  ;;  %v216_v23 = vld [vmem:[#allocation5 + $0xa0] sm:$0xff] }
  0xca   :  { %2254 = vmatprep.subr.bf16.mxu1 %v2253_v8  ;;  %v2227_v17 = vpack.c.bf16 %v199_v15, %v198_v14  ;;  %v247_v19 = vld [vmem:[#allocation5 + $0x198] sm:$0xff]  ;;  %v230_v20 = vld [vmem:[#allocation5 + $0x110] sm:$0xff]  ;;  %v217_v24 = vld [vmem:[#allocation5 + $0xa8] sm:$0xff]  ;;  %2226 = vmatprep.subr.bf16.mxu0 %v2225_v16  ;;  %p2932_p7 = por %p2931_p6, %p2930_p5 }
  0xcb   :  { %2256 = vmatpush3.bf16.msra.mxu1 %v2255_v12  ;;  %v2257_v21 = vpack.c.bf16 %v247_v19, %v246_v18  ;;  %v231_v22 = vld [vmem:[#allocation5 + $0x118] sm:$0xff]  ;;  %v2229_v26 = vpack.c.bf16 %v217_v24, %v216_v23  ;;  %v200_v27 = vld [vmem:[#allocation5 + $0x20] sm:$0xff]  ;;  %v201_v28 = vld [vmem:[#allocation5 + $0x28] sm:$0xff] }
  0xcc   :  { %v2259_v25 = vpack.c.bf16 %v231_v22, %v230_v20  ;;  %v248_v29 = vld [vmem:[#allocation5 + $0x1a0] sm:$0xff]  ;;  %v249_v30 = vld [vmem:[#allocation5 + $0x1a8] sm:$0xff]  ;;  %v2231_v33 = vpack.c.bf16 %v201_v28, %v200_v27  ;;  %v218_v35 = vld [vmem:[#allocation5 + $0xb0] sm:$0xff]  ;;  %p2933_p8 = pnand %p2932_p7, %p2926_p4 }
  0xcd   :  { %2258 = vmatprep.subr.bf16.mxu1 %v2257_v21  ;;  %v232_v31 = vld [vmem:[#allocation5 + $0x120] sm:$0xff]  ;;  %v233_v32 = vld [vmem:[#allocation5 + $0x128] sm:$0xff]  ;;  %2228 = vmatpush3.bf16.msra.mxu0 %v2227_v17  ;;  %v2261_v34 = vpack.c.bf16 %v249_v30, %v248_v29  ;;  %v219_v36 = vld [vmem:[#allocation5 + $0xb8] sm:$0xff] }
  0xce   :  { %v202_v37 = vld [vmem:[#allocation5 + $0x30] sm:$0xff]  ;;  %2230 = vmatprep.subr.bf16.mxu0 %v2229_v26  ;;  %v2263_v38 = vpack.c.bf16 %v233_v32, %v232_v31  ;;  %v2233_v39 = vpack.c.bf16 %v219_v36, %v218_v35  ;;  %v203_v40 = vld [vmem:[#allocation5 + $0x38] sm:$0xff]  ;;  %v220_v46 = vld [vmem:[#allocation5 + $0xc0] sm:$0xff] }
  0xcf   :  { %2260 = vmatpush3.bf16.msra.mxu1 %v2259_v25  ;;  %v250_v41 = vld [vmem:[#allocation5 + $0x1b0] sm:$0xff]  ;;  %v251_v42 = vld [vmem:[#allocation5 + $0x1b8] sm:$0xff]  ;;  %v221_v47 = vld [vmem:[#allocation5 + $0xc8] sm:$0xff]  ;;  %v2235_v48 = vpack.c.bf16 %v203_v40, %v202_v37 }
  0xd0   :  { %2262 = vmatprep.subr.bf16.mxu1 %v2261_v34  ;;  %v2265_v43 = vpack.c.bf16 %v251_v42, %v250_v41  ;;  %v234_v44 = vld [vmem:[#allocation5 + $0x130] sm:$0xff]  ;;  %v235_v45 = vld [vmem:[#allocation5 + $0x138] sm:$0xff]  ;;  %v252_v49 = vld [vmem:[#allocation5 + $0x1c0] sm:$0xff]  ;;  %v2237_v52 = vpack.c.bf16 %v221_v47, %v220_v46 }
  0xd1   :  { %2232 = vmatpush3.bf16.msra.mxu0 %v2231_v33  ;;  %v253_v50 = vld [vmem:[#allocation5 + $0x1c8] sm:$0xff]  ;;  %v2267_v51 = vpack.c.bf16 %v235_v45, %v234_v44  ;;  %v204_v53 = vld [vmem:[#allocation5 + $0x40] sm:$0xff]  ;;  %v222_v58 = vld [vmem:[#allocation5 + $0xd0] sm:$0xff] }
  0xd2   :  { %2234 = vmatprep.subr.bf16.mxu0 %v2233_v39  ;;  %v205_v54 = vld [vmem:[#allocation5 + $0x48] sm:$0xff]  ;;  %v236_v55 = vld [vmem:[#allocation5 + $0x140] sm:$0xff]  ;;  %v2269_v56 = vpack.c.bf16 %v253_v50, %v252_v49  ;;  %v223_v59 = vld [vmem:[#allocation5 + $0xd8] sm:$0xff] }
  0xd3   :  { %2264 = vmatpush3.bf16.msra.mxu1 %v2263_v38  ;;  %v237_v57 = vld [vmem:[#allocation5 + $0x148] sm:$0xff]  ;;  %v254_v60 = vld [vmem:[#allocation5 + $0x1d0] sm:$0xff]  ;;  %v255_v61 = vld [vmem:[#allocation5 + $0x1d8] sm:$0xff]  ;;  %v2239_v62 = vpack.c.bf16 %v205_v54, %v204_v53  ;;  %v2241_v0 = vpack.c.bf16 %v223_v59, %v222_v58 }
  0xd4   :  { %2266 = vmatprep.subr.bf16.mxu1 %v2265_v43  ;;  %v2271_v63 = vpack.c.bf16 %v237_v57, %v236_v55  ;;  %v206_v1 = vld [vmem:[#allocation5 + $0x50] sm:$0xff]  ;;  %v207_v2 = vld [vmem:[#allocation5 + $0x58] sm:$0xff]  ;;  %v2273_v4 = vpack.c.bf16 %v255_v61, %v254_v60  ;;  %v224_v6 = vld [vmem:[#allocation5 + $0xe0] sm:$0xff] }
  0xd5   :  { %2236 = vmatpush3.bf16.msra.mxu0 %v2235_v48  ;;  %v238_v3 = vld [vmem:[#allocation5 + $0x150] sm:$0xff]  ;;  %v239_v5 = vld [vmem:[#allocation5 + $0x158] sm:$0xff]  ;;  %v225_v7 = vld [vmem:[#allocation5 + $0xe8] sm:$0xff]  ;;  %v2243_v10 = vpack.c.bf16 %v207_v2, %v206_v1 }
  0xd6   :  { %2238 = vmatprep.subr.bf16.mxu0 %v2237_v52  ;;  %v256_v8 = vld [vmem:[#allocation5 + $0x1e0] sm:$0xff]  ;;  %v257_v9 = vld [vmem:[#allocation5 + $0x1e8] sm:$0xff]  ;;  %v2275_v13 = vpack.c.bf16 %v239_v5, %v238_v3  ;;  %v2245_v14 = vpack.c.bf16 %v225_v7, %v224_v6  ;;  %v226_v19 = vld [vmem:[#allocation5 + $0xf0] sm:$0xff] }
  0xd7   :  { %2268 = vmatpush3.bf16.msra.mxu1 %v2267_v51  ;;  %v208_v11 = vld [vmem:[#allocation5 + $0x60] sm:$0xff]  ;;  %v209_v12 = vld [vmem:[#allocation5 + $0x68] sm:$0xff]  ;;  %v2277_v18 = vpack.c.bf16 %v257_v9, %v256_v8  ;;  %v227_v20 = vld [vmem:[#allocation5 + $0xf8] sm:$0xff] }
  0xd8   :  { %2270 = vmatprep.subr.bf16.mxu1 %v2269_v56  ;;  %v240_v15 = vld [vmem:[#allocation5 + $0x160] sm:$0xff]  ;;  %v241_v16 = vld [vmem:[#allocation5 + $0x168] sm:$0xff]  ;;  %v175_v21 = vld [vmem:[#allocation2 + $0x18] sm:$0xff]  ;;  %v2247_v24 = vpack.c.bf16 %v209_v12, %v208_v11  ;;  %v2249_v26 = vpack.c.bf16 %v227_v20, %v226_v19 }
  0xd9   :  { %2240 = vmatpush3.bf16.msra.mxu0 %v2239_v62  ;;  %v173_v17 = vld [vmem:[#allocation2 + $0x8] sm:$0xff]  ;;  %v258_v22 = vld [vmem:[#allocation5 + $0x1f0] sm:$0xff]  ;;  %v259_v23 = vld [vmem:[#allocation5 + $0x1f8] sm:$0xff]  ;;  %721 = vmatprep.mubr.f32.mxu1 %v175_v21  ;;  %v2279_v25 = vpack.c.bf16 %v241_v16, %v240_v15 }
  0xda   :  { %2242 = vmatprep.subr.bf16.mxu0 %v2241_v0  ;;  %651 = vmatprep.mubr.f32.mxu0 %v173_v17  ;;  %v210_v27 = vld [vmem:[#allocation5 + $0x70] sm:$0xff]  ;;  %v211_v28 = vld [vmem:[#allocation5 + $0x78] sm:$0xff]  ;;  %v2281_v30 = vpack.c.bf16 %v259_v23, %v258_v22  ;;  %v276_v32 = vld [vmem:[#allocation5 + $0x280] sm:$0xff] }
  0xdb   :  { %2272 = vmatpush3.bf16.msra.mxu1 %v2271_v63  ;;  %v242_v29 = vld [vmem:[#allocation5 + $0x170] sm:$0xff]  ;;  %v243_v31 = vld [vmem:[#allocation5 + $0x178] sm:$0xff]  ;;  %v277_v33 = vld [vmem:[#allocation5 + $0x288] sm:$0xff]  ;;  %v2251_v36 = vpack.c.bf16 %v211_v28, %v210_v27 }
  0xdc   :  { %2274 = vmatprep.subr.bf16.mxu1 %v2273_v4  ;;  %v308_v34 = vld [vmem:[#allocation5 + $0x380] sm:$0xff]  ;;  %v309_v35 = vld [vmem:[#allocation5 + $0x388] sm:$0xff]  ;;  %v2283_v37 = vpack.c.bf16 %v243_v31, %v242_v29  ;;  %v2285_v38 = vpack.c.bf16 %v277_v33, %v276_v32  ;;  %v278_v44 = vld [vmem:[#allocation5 + $0x290] sm:$0xff] }
  0xdd   :  { %2244 = vmatpush3.bf16.msra.mxu0 %v2243_v10  ;;  %v260_v39 = vld [vmem:[#allocation5 + $0x200] sm:$0xff]  ;;  %v261_v40 = vld [vmem:[#allocation5 + $0x208] sm:$0xff]  ;;  %v2317_v42 = vpack.c.bf16 %v309_v35, %v308_v34  ;;  %v279_v45 = vld [vmem:[#allocation5 + $0x298] sm:$0xff] }
  0xde   :  { %2246 = vmatprep.subr.bf16.mxu0 %v2245_v14  ;;  %v292_v41 = vld [vmem:[#allocation5 + $0x300] sm:$0xff]  ;;  %v293_v43 = vld [vmem:[#allocation5 + $0x308] sm:$0xff]  ;;  %v310_v46 = vld [vmem:[#allocation5 + $0x390] sm:$0xff]  ;;  %v2287_v49 = vpack.c.bf16 %v261_v40, %v260_v39  ;;  %v2289_v52 = vpack.c.bf16 %v279_v45, %v278_v44 }
  0xdf   :  { %2276 = vmatpush3.bf16.msra.mxu1 %v2275_v13  ;;  %v311_v47 = vld [vmem:[#allocation5 + $0x398] sm:$0xff]  ;;  %v172_v48 = vld [vmem:[#allocation2] sm:$0xff]  ;;  %v174_v50 = vld [vmem:[#allocation2 + $0x10] sm:$0xff]  ;;  %v2319_v51 = vpack.c.bf16 %v293_v43, %v292_v41 }
  0xe0   :  { %2278 = vmatprep.subr.bf16.mxu1 %v2277_v18  ;;  %v262_v53 = vld [vmem:[#allocation5 + $0x210] sm:$0xff]  ;;  %v263_v54 = vld [vmem:[#allocation5 + $0x218] sm:$0xff]  ;;  %v2321_v56 = vpack.c.bf16 %v311_v47, %v310_v46  ;;  %v280_v58 = vld [vmem:[#allocation5 + $0x2a0] sm:$0xff] }
  0xe1   :  { %2248 = vmatpush3.bf16.msra.mxu0 %v2247_v24  ;;  %v294_v55 = vld [vmem:[#allocation5 + $0x310] sm:$0xff]  ;;  %v295_v57 = vld [vmem:[#allocation5 + $0x318] sm:$0xff]  ;;  %v281_v59 = vld [vmem:[#allocation5 + $0x2a8] sm:$0xff]  ;;  %v2291_v62 = vpack.c.bf16 %v263_v54, %v262_v53 }
  0xe2   :  { %2250 = vmatprep.subr.bf16.mxu0 %v2249_v26  ;;  %v312_v60 = vld [vmem:[#allocation5 + $0x3a0] sm:$0xff]  ;;  %v313_v61 = vld [vmem:[#allocation5 + $0x3a8] sm:$0xff]  ;;  %v2323_v63 = vpack.c.bf16 %v295_v57, %v294_v55  ;;  %v2293_v0 = vpack.c.bf16 %v281_v59, %v280_v58  ;;  %v282_v6 = vld [vmem:[#allocation5 + $0x2b0] sm:$0xff] }
  0xe3   :  { %2280 = vmatpush3.bf16.msra.mxu1 %v2279_v25  ;;  %v264_v1 = vld [vmem:[#allocation5 + $0x220] sm:$0xff]  ;;  %v265_v2 = vld [vmem:[#allocation5 + $0x228] sm:$0xff]  ;;  %v2325_v4 = vpack.c.bf16 %v313_v61, %v312_v60  ;;  %v283_v7 = vld [vmem:[#allocation5 + $0x2b8] sm:$0xff] }
  0xe4   :  { %2282 = vmatprep.subr.bf16.mxu1 %v2281_v30  ;;  %v296_v3 = vld [vmem:[#allocation5 + $0x320] sm:$0xff]  ;;  %v297_v5 = vld [vmem:[#allocation5 + $0x328] sm:$0xff]  ;;  %v314_v8 = vld [vmem:[#allocation5 + $0x3b0] sm:$0xff]  ;;  %v2295_v10 = vpack.c.bf16 %v265_v2, %v264_v1  ;;  %v2297_v12 = vpack.c.bf16 %v283_v7, %v282_v6 }
  0xe5   :  { %2252 = vmatpush3.bf16.msra.mxu0 %v2251_v36  ;;  %v315_v9 = vld [vmem:[#allocation5 + $0x3b8] sm:$0xff]  ;;  %v2327_v11 = vpack.c.bf16 %v297_v5, %v296_v3  ;;  %v266_v13 = vld [vmem:[#allocation5 + $0x230] sm:$0xff]  ;;  %v284_v18 = vld [vmem:[#allocation5 + $0x2c0] sm:$0xff] }
  0xe6   :  { %2286 = vmatprep.subr.bf16.mxu0 %v2285_v38  ;;  %v267_v14 = vld [vmem:[#allocation5 + $0x238] sm:$0xff]  ;;  %v298_v15 = vld [vmem:[#allocation5 + $0x330] sm:$0xff]  ;;  %v2329_v16 = vpack.c.bf16 %v315_v9, %v314_v8  ;;  %v285_v19 = vld [vmem:[#allocation5 + $0x2c8] sm:$0xff] }
  0xe7   :  { %2284 = vmatpush3.bf16.msra.mxu1 %v2283_v37  ;;  %v299_v17 = vld [vmem:[#allocation5 + $0x338] sm:$0xff]  ;;  %v316_v20 = vld [vmem:[#allocation5 + $0x3c0] sm:$0xff]  ;;  %v317_v21 = vld [vmem:[#allocation5 + $0x3c8] sm:$0xff]  ;;  %v2299_v22 = vpack.c.bf16 %v267_v14, %v266_v13  ;;  %v2301_v26 = vpack.c.bf16 %v285_v19, %v284_v18 }
  0xe8   :  { %2318 = vmatprep.subr.bf16.mxu1 %v2317_v42  ;;  %652 = vmatmul.mubr.f32.vlgmr.msra.gmra.mrb[0].mxu0 %v172_v48  ;;  %v268_v23 = vld [vmem:[#allocation5 + $0x240] sm:$0xff]  ;;  %v177_v24 = vld [vmem:[#allocation2 + $0x28] sm:$0xff]  ;;  %v2331_v25 = vpack.c.bf16 %v299_v17, %v298_v15  ;;  %v179_v29 = vld [vmem:[#allocation2 + $0x38] sm:$0xff]  ;;  %v2333_v30 = vpack.c.bf16 %v317_v21, %v316_v20 }
  0xe9   :  { %2288 = vmatpush3.bf16.msra.mxu0 %v2287_v49  ;;  %v269_v27 = vld [vmem:[#allocation5 + $0x248] sm:$0xff]  ;;  %v300_v28 = vld [vmem:[#allocation5 + $0x340] sm:$0xff]  ;;  %v286_v32 = vld [vmem:[#allocation5 + $0x2d0] sm:$0xff]  ;;  %791 = vmatprep.mubr.f32.mxu0 %v177_v24 }
  0xea   :  { %722 = vmatmul.mubr.f32.vlgmr.msra.gmra.mrb[0].mxu1 %v174_v50  ;;  %2290 = vmatprep.subr.bf16.mxu0 %v2289_v52  ;;  %v301_v31 = vld [vmem:[#allocation5 + $0x348] sm:$0xff]  ;;  %v287_v33 = vld [vmem:[#allocation5 + $0x2d8] sm:$0xff]  ;;  %v318_v34 = vld [vmem:[#allocation5 + $0x3d0] sm:$0xff]  ;;  %v2303_v36 = vpack.c.bf16 %v269_v27, %v268_v23 }
  0xeb   :  { %2320 = vmatpush3.bf16.msra.mxu1 %v2319_v51  ;;  %v319_v35 = vld [vmem:[#allocation5 + $0x3d8] sm:$0xff]  ;;  %861 = vmatprep.mubr.f32.mxu1 %v179_v29  ;;  %v2335_v37 = vpack.c.bf16 %v301_v31, %v300_v28  ;;  %v2305_v38 = vpack.c.bf16 %v287_v33, %v286_v32  ;;  %v270_v39 = vld [vmem:[#allocation5 + $0x250] sm:$0xff]  ;;  %v288_v44 = vld [vmem:[#allocation5 + $0x2e0] sm:$0xff] }
  0xec   :  { %2322 = vmatprep.subr.bf16.mxu1 %v2321_v56  ;;  %v271_v40 = vld [vmem:[#allocation5 + $0x258] sm:$0xff]  ;;  %v302_v41 = vld [vmem:[#allocation5 + $0x350] sm:$0xff]  ;;  %v2337_v42 = vpack.c.bf16 %v319_v35, %v318_v34  ;;  %v289_v45 = vld [vmem:[#allocation5 + $0x2e8] sm:$0xff] }
  0xed   :  { %2292 = vmatpush3.bf16.msra.mxu0 %v2291_v62  ;;  %v303_v43 = vld [vmem:[#allocation5 + $0x358] sm:$0xff]  ;;  %v320_v46 = vld [vmem:[#allocation5 + $0x3e0] sm:$0xff]  ;;  %v321_v47 = vld [vmem:[#allocation5 + $0x3e8] sm:$0xff]  ;;  %v2307_v48 = vpack.c.bf16 %v271_v40, %v270_v39  ;;  %v2309_v50 = vpack.c.bf16 %v289_v45, %v288_v44 }
  0xee   :  { %2294 = vmatprep.subr.bf16.mxu0 %v2293_v0  ;;  %v2339_v49 = vpack.c.bf16 %v303_v43, %v302_v41  ;;  %v272_v51 = vld [vmem:[#allocation5 + $0x260] sm:$0xff]  ;;  %v273_v52 = vld [vmem:[#allocation5 + $0x268] sm:$0xff]  ;;  %v2341_v54 = vpack.c.bf16 %v321_v47, %v320_v46  ;;  %v290_v56 = vld [vmem:[#allocation5 + $0x2f0] sm:$0xff] }
  0xef   :  { %2324 = vmatpush3.bf16.msra.mxu1 %v2323_v63  ;;  %v304_v53 = vld [vmem:[#allocation5 + $0x360] sm:$0xff]  ;;  %v305_v55 = vld [vmem:[#allocation5 + $0x368] sm:$0xff]  ;;  %v291_v57 = vld [vmem:[#allocation5 + $0x2f8] sm:$0xff]  ;;  %v2311_v60 = vpack.c.bf16 %v273_v52, %v272_v51 }
  0xf0   :  { %2326 = vmatprep.subr.bf16.mxu1 %v2325_v4  ;;  %v322_v58 = vld [vmem:[#allocation5 + $0x3f0] sm:$0xff]  ;;  %v323_v59 = vld [vmem:[#allocation5 + $0x3f8] sm:$0xff]  ;;  %v2343_v61 = vpack.c.bf16 %v305_v55, %v304_v53  ;;  %v2313_v62 = vpack.c.bf16 %v291_v57, %v290_v56  ;;  %v340_v4 = vld [vmem:[#allocation5 + $0x480] sm:$0xff] }
  0xf1   :  { %2296 = vmatpush3.bf16.msra.mxu0 %v2295_v10  ;;  %v274_v63 = vld [vmem:[#allocation5 + $0x270] sm:$0xff]  ;;  %v275_v0 = vld [vmem:[#allocation5 + $0x278] sm:$0xff]  ;;  %v2345_v2 = vpack.c.bf16 %v323_v59, %v322_v58  ;;  %v341_v5 = vld [vmem:[#allocation5 + $0x488] sm:$0xff] }
  0xf2   :  { %2298 = vmatprep.subr.bf16.mxu0 %v2297_v12  ;;  %v306_v1 = vld [vmem:[#allocation5 + $0x370] sm:$0xff]  ;;  %v307_v3 = vld [vmem:[#allocation5 + $0x378] sm:$0xff]  ;;  %v372_v6 = vld [vmem:[#allocation5 + $0x580] sm:$0xff]  ;;  %v2315_v8 = vpack.c.bf16 %v275_v0, %v274_v63  ;;  %v2349_v10 = vpack.c.bf16 %v341_v5, %v340_v4 }
  0xf3   :  { %2328 = vmatpush3.bf16.msra.mxu1 %v2327_v11  ;;  %v373_v7 = vld [vmem:[#allocation5 + $0x588] sm:$0xff]  ;;  %v2347_v9 = vpack.c.bf16 %v307_v3, %v306_v1  ;;  %v324_v11 = vld [vmem:[#allocation5 + $0x400] sm:$0xff]  ;;  %v343_v17 = vld [vmem:[#allocation5 + $0x498] sm:$0xff] }
  0xf4   :  { %2330 = vmatprep.subr.bf16.mxu1 %v2329_v16  ;;  %v325_v12 = vld [vmem:[#allocation5 + $0x408] sm:$0xff]  ;;  %v356_v13 = vld [vmem:[#allocation5 + $0x500] sm:$0xff]  ;;  %v2381_v14 = vpack.c.bf16 %v373_v7, %v372_v6  ;;  %v342_v16 = vld [vmem:[#allocation5 + $0x490] sm:$0xff] }
  0xf5   :  { %2300 = vmatpush3.bf16.msra.mxu0 %v2299_v22  ;;  %v357_v15 = vld [vmem:[#allocation5 + $0x508] sm:$0xff]  ;;  %v374_v18 = vld [vmem:[#allocation5 + $0x590] sm:$0xff]  ;;  %v375_v19 = vld [vmem:[#allocation5 + $0x598] sm:$0xff]  ;;  %v2351_v21 = vpack.c.bf16 %v325_v12, %v324_v11  ;;  %v2353_v24 = vpack.c.bf16 %v343_v17, %v342_v16 }
  0xf6   :  { %2302 = vmatprep.subr.bf16.mxu0 %v2301_v26  ;;  %v176_v20 = vld [vmem:[#allocation2 + $0x20] sm:$0xff]  ;;  %v178_v22 = vld [vmem:[#allocation2 + $0x30] sm:$0xff]  ;;  %v2383_v23 = vpack.c.bf16 %v357_v15, %v356_v13  ;;  %v327_v26 = vld [vmem:[#allocation5 + $0x418] sm:$0xff]  ;;  %v2385_v28 = vpack.c.bf16 %v375_v19, %v374_v18 }
  0xf7   :  { %2332 = vmatpush3.bf16.msra.mxu1 %v2331_v25  ;;  %v326_v25 = vld [vmem:[#allocation5 + $0x410] sm:$0xff]  ;;  %v359_v29 = vld [vmem:[#allocation5 + $0x518] sm:$0xff]  ;;  %v345_v31 = vld [vmem:[#allocation5 + $0x4a8] sm:$0xff] }
  0xf8   :  { %2334 = vmatprep.subr.bf16.mxu1 %v2333_v30  ;;  %v358_v27 = vld [vmem:[#allocation5 + $0x510] sm:$0xff]  ;;  %v344_v30 = vld [vmem:[#allocation5 + $0x4a0] sm:$0xff]  ;;  %v377_v33 = vld [vmem:[#allocation5 + $0x5a8] sm:$0xff]  ;;  %v2355_v35 = vpack.c.bf16 %v327_v26, %v326_v25 }
  0xf9   :  { %2304 = vmatpush3.bf16.msra.mxu0 %v2303_v36  ;;  %v376_v32 = vld [vmem:[#allocation5 + $0x5a0] sm:$0xff]  ;;  %v181_v34 = vld [vmem:[#allocation2 + $0x48] sm:$0xff]  ;;  %v183_v36 = vld [vmem:[#allocation2 + $0x58] sm:$0xff] }
  0xfa   :  { %2306 = vmatprep.subr.bf16.mxu0 %v2305_v38  ;;  %v2357_v38 = vpack.c.bf16 %v345_v31, %v344_v30  ;;  %v328_v39 = vld [vmem:[#allocation5 + $0x420] sm:$0xff]  ;;  %v329_v40 = vld [vmem:[#allocation5 + $0x428] sm:$0xff]  ;;  %v346_v44 = vld [vmem:[#allocation5 + $0x4b0] sm:$0xff] }
  0xfb   :  { %2336 = vmatpush3.bf16.msra.mxu1 %v2335_v37  ;;  %v2387_v37 = vpack.c.bf16 %v359_v29, %v358_v27  ;;  %v360_v41 = vld [vmem:[#allocation5 + $0x520] sm:$0xff]  ;;  %v361_v43 = vld [vmem:[#allocation5 + $0x528] sm:$0xff]  ;;  %v347_v45 = vld [vmem:[#allocation5 + $0x4b8] sm:$0xff] }
  0xfc   :  { %2338 = vmatprep.subr.bf16.mxu1 %v2337_v42  ;;  %v2389_v42 = vpack.c.bf16 %v377_v33, %v376_v32  ;;  %v378_v46 = vld [vmem:[#allocation5 + $0x5b0] sm:$0xff]  ;;  %v379_v47 = vld [vmem:[#allocation5 + $0x5b8] sm:$0xff]  ;;  %v348_v56 = vld [vmem:[#allocation5 + $0x4c0] sm:$0xff] }
  0xfd   :  { %2308 = vmatpush3.bf16.msra.mxu0 %v2307_v48  ;;  %v2359_v48 = vpack.c.bf16 %v329_v40, %v328_v39  ;;  %v330_v51 = vld [vmem:[#allocation5 + $0x430] sm:$0xff]  ;;  %v331_v52 = vld [vmem:[#allocation5 + $0x438] sm:$0xff]  ;;  %v349_v57 = vld [vmem:[#allocation5 + $0x4c8] sm:$0xff] }
  0xfe   :  { %2310 = vmatprep.subr.bf16.mxu0 %v2309_v50  ;;  %v2361_v50 = vpack.c.bf16 %v347_v45, %v346_v44  ;;  %v362_v53 = vld [vmem:[#allocation5 + $0x530] sm:$0xff]  ;;  %v363_v55 = vld [vmem:[#allocation5 + $0x538] sm:$0xff]  ;;  %v380_v58 = vld [vmem:[#allocation5 + $0x5c0] sm:$0xff] }
  0xff   :  { %2340 = vmatpush3.bf16.msra.mxu1 %v2339_v49  ;;  %v2391_v49 = vpack.c.bf16 %v361_v43, %v360_v41  ;;  %v381_v59 = vld [vmem:[#allocation5 + $0x5c8] sm:$0xff]  ;;  %v332_v63 = vld [vmem:[#allocation5 + $0x440] sm:$0xff]  ;;  %v350_v4 = vld [vmem:[#allocation5 + $0x4d0] sm:$0xff] }
 0x100   :  { %2342 = vmatprep.subr.bf16.mxu1 %v2341_v54  ;;  %v2393_v54 = vpack.c.bf16 %v379_v47, %v378_v46  ;;  %v333_v0 = vld [vmem:[#allocation5 + $0x448] sm:$0xff]  ;;  %v364_v1 = vld [vmem:[#allocation5 + $0x540] sm:$0xff]  ;;  %v351_v5 = vld [vmem:[#allocation5 + $0x4d8] sm:$0xff] }
 0x101   :  { %2312 = vmatpush3.bf16.msra.mxu0 %v2311_v60  ;;  %v2363_v60 = vpack.c.bf16 %v331_v52, %v330_v51  ;;  %v365_v3 = vld [vmem:[#allocation5 + $0x548] sm:$0xff]  ;;  %v382_v6 = vld [vmem:[#allocation5 + $0x5d0] sm:$0xff]  ;;  %v383_v7 = vld [vmem:[#allocation5 + $0x5d8] sm:$0xff] }
 0x102   :  { %2314 = vmatprep.subr.bf16.mxu0 %v2313_v62  ;;  %v2365_v62 = vpack.c.bf16 %v349_v57, %v348_v56  ;;  %v334_v11 = vld [vmem:[#allocation5 + $0x450] sm:$0xff]  ;;  %v335_v12 = vld [vmem:[#allocation5 + $0x458] sm:$0xff]  ;;  %v352_v16 = vld [vmem:[#allocation5 + $0x4e0] sm:$0xff] }
 0x103   :  { %2344 = vmatpush3.bf16.msra.mxu1 %v2343_v61  ;;  %v2395_v61 = vpack.c.bf16 %v363_v55, %v362_v53  ;;  %v366_v13 = vld [vmem:[#allocation5 + $0x550] sm:$0xff]  ;;  %v367_v15 = vld [vmem:[#allocation5 + $0x558] sm:$0xff]  ;;  %v353_v17 = vld [vmem:[#allocation5 + $0x4e8] sm:$0xff] }
 0x104   :  { %2346 = vmatprep.subr.bf16.mxu1 %v2345_v2  ;;  %v2397_v2 = vpack.c.bf16 %v381_v59, %v380_v58  ;;  %v384_v18 = vld [vmem:[#allocation5 + $0x5e0] sm:$0xff]  ;;  %v385_v19 = vld [vmem:[#allocation5 + $0x5e8] sm:$0xff]  ;;  %v355_v29 = vld [vmem:[#allocation5 + $0x4f8] sm:$0xff] }
 0x105   :  { %2316 = vmatpush3.bf16.msra.mxu0 %v2315_v8  ;;  %v2367_v8 = vpack.c.bf16 %v333_v0, %v332_v63  ;;  %v368_v25 = vld [vmem:[#allocation5 + $0x560] sm:$0xff]  ;;  %v2405_v26 = vpack.c.bf16 %v385_v19, %v384_v18  ;;  %v369_v27 = vld [vmem:[#allocation5 + $0x568] sm:$0xff]  ;;  %v386_v30 = vld [vmem:[#allocation5 + $0x5f0] sm:$0xff] }
 0x106   :  { %2350 = vmatprep.subr.bf16.mxu0 %v2349_v10  ;;  %v2369_v10 = vpack.c.bf16 %v351_v5, %v350_v4  ;;  %v387_v31 = vld [vmem:[#allocation5 + $0x5f8] sm:$0xff]  ;;  %v2407_v33 = vpack.c.bf16 %v369_v27, %v368_v25  ;;  %v404_v40 = vld [vmem:[#allocation5 + $0x680] sm:$0xff]  ;;  %v405_v41 = vld [vmem:[#allocation5 + $0x688] sm:$0xff] }
 0x107   :  { %2348 = vmatpush3.bf16.msra.mxu1 %v2347_v9  ;;  %v2399_v9 = vpack.c.bf16 %v365_v3, %v364_v1  ;;  %v371_v39 = vld [vmem:[#allocation5 + $0x578] sm:$0xff]  ;;  %v437_v43 = vld [vmem:[#allocation5 + $0x788] sm:$0xff]  ;;  %v2413_v46 = vpack.c.bf16 %v405_v41, %v404_v40  ;;  %v388_v47 = vld [vmem:[#allocation5 + $0x600] sm:$0xff] }
 0x108   :  { %2382 = vmatprep.subr.bf16.mxu1 %v2381_v14  ;;  %792 = vmatmul.mubr.f32.vlgmr.msra.gmra.mrb[2].mxu0 %v176_v20  ;;  %v2401_v14 = vpack.c.bf16 %v383_v7, %v382_v6  ;;  %v2371_v20 = vpack.c.bf16 %v335_v12, %v334_v11  ;;  %v421_v51 = vld [vmem:[#allocation5 + $0x708] sm:$0xff]  ;;  %v406_v52 = vld [vmem:[#allocation5 + $0x690] sm:$0xff]  ;;  %v407_v53 = vld [vmem:[#allocation5 + $0x698] sm:$0xff] }
 0x109   :  { %2352 = vmatpush3.bf16.msra.mxu0 %v2351_v21  ;;  %931 = vmatprep.mubr.f32.mxu0 %v181_v34  ;;  %v2403_v21 = vpack.c.bf16 %v367_v15, %v366_v13  ;;  %v439_v55 = vld [vmem:[#allocation5 + $0x798] sm:$0xff]  ;;  %v180_v56 = vld [vmem:[#allocation2 + $0x40] sm:$0xff]  ;;  %v182_v58 = vld [vmem:[#allocation2 + $0x50] sm:$0xff] }
 0x10a   :  { %862 = vmatmul.mubr.f32.vlgmr.msra.gmra.mrb[2].mxu1 %v178_v22  ;;  %2354 = vmatprep.subr.bf16.mxu0 %v2353_v24  ;;  %v2373_v22 = vpack.c.bf16 %v353_v17, %v352_v16  ;;  %v337_v24 = vld [vmem:[#allocation5 + $0x468] sm:$0xff]  ;;  %v422_v63 = vld [vmem:[#allocation5 + $0x710] sm:$0xff]  ;;  %v423_v1 = vld [vmem:[#allocation5 + $0x718] sm:$0xff] }
 0x10b   :  { %2384 = vmatpush3.bf16.msra.mxu1 %v2383_v23  ;;  %1001 = vmatprep.mubr.f32.mxu1 %v183_v36  ;;  %v336_v23 = vld [vmem:[#allocation5 + $0x460] sm:$0xff]  ;;  %v339_v36 = vld [vmem:[#allocation5 + $0x478] sm:$0xff]  ;;  %v409_v3 = vld [vmem:[#allocation5 + $0x6a8] sm:$0xff] }
 0x10c   :  { %2386 = vmatprep.subr.bf16.mxu1 %v2385_v28  ;;  %v354_v28 = vld [vmem:[#allocation5 + $0x4f0] sm:$0xff]  ;;  %v2375_v32 = vpack.c.bf16 %v337_v24, %v336_v23  ;;  %v440_v4 = vld [vmem:[#allocation5 + $0x7a0] sm:$0xff]  ;;  %v441_v5 = vld [vmem:[#allocation5 + $0x7a8] sm:$0xff] }
 0x10d   :  { %2356 = vmatpush3.bf16.msra.mxu0 %v2355_v35  ;;  %v2377_v34 = vpack.c.bf16 %v355_v29, %v354_v28  ;;  %v338_v35 = vld [vmem:[#allocation5 + $0x470] sm:$0xff]  ;;  %v185_v6 = vld [vmem:[#allocation2 + $0x68] sm:$0xff]  ;;  %v392_v11 = vld [vmem:[#allocation5 + $0x620] sm:$0xff] }
 0x10e   :  { %2358 = vmatprep.subr.bf16.mxu0 %v2357_v38  ;;  %v2409_v38 = vpack.c.bf16 %v387_v31, %v386_v30  ;;  %v2379_v44 = vpack.c.bf16 %v339_v36, %v338_v35  ;;  %v393_v12 = vld [vmem:[#allocation5 + $0x628] sm:$0xff]  ;;  %v424_v13 = vld [vmem:[#allocation5 + $0x720] sm:$0xff]  ;;  %v410_v16 = vld [vmem:[#allocation5 + $0x6b0] sm:$0xff] }
 0x10f   :  { %2388 = vmatpush3.bf16.msra.mxu1 %v2387_v37  ;;  %v370_v37 = vld [vmem:[#allocation5 + $0x570] sm:$0xff]  ;;  %v425_v15 = vld [vmem:[#allocation5 + $0x728] sm:$0xff]  ;;  %v411_v17 = vld [vmem:[#allocation5 + $0x6b8] sm:$0xff] }
 0x110   :  { %2390 = vmatprep.subr.bf16.mxu1 %v2389_v42  ;;  %v436_v42 = vld [vmem:[#allocation5 + $0x780] sm:$0xff]  ;;  %v2411_v45 = vpack.c.bf16 %v371_v39, %v370_v37  ;;  %v442_v18 = vld [vmem:[#allocation5 + $0x7b0] sm:$0xff]  ;;  %v443_v19 = vld [vmem:[#allocation5 + $0x7b8] sm:$0xff] }
 0x111   :  { %2360 = vmatpush3.bf16.msra.mxu0 %v2359_v48  ;;  %v389_v48 = vld [vmem:[#allocation5 + $0x608] sm:$0xff]  ;;  %v394_v23 = vld [vmem:[#allocation5 + $0x630] sm:$0xff]  ;;  %v395_v24 = vld [vmem:[#allocation5 + $0x638] sm:$0xff] }
 0x112   :  { %2362 = vmatprep.subr.bf16.mxu0 %v2361_v50  ;;  %v2445_v50 = vpack.c.bf16 %v437_v43, %v436_v42  ;;  %v2415_v57 = vpack.c.bf16 %v389_v48, %v388_v47  ;;  %v426_v25 = vld [vmem:[#allocation5 + $0x730] sm:$0xff]  ;;  %v427_v27 = vld [vmem:[#allocation5 + $0x738] sm:$0xff]  ;;  %v412_v28 = vld [vmem:[#allocation5 + $0x6c0] sm:$0xff] }
 0x113   :  { %2392 = vmatpush3.bf16.msra.mxu1 %v2391_v49  ;;  %v420_v49 = vld [vmem:[#allocation5 + $0x700] sm:$0xff]  ;;  %v413_v29 = vld [vmem:[#allocation5 + $0x6c8] sm:$0xff]  ;;  %v414_v40 = vld [vmem:[#allocation5 + $0x6d0] sm:$0xff] }
 0x114   :  { %2394 = vmatprep.subr.bf16.mxu1 %v2393_v54  ;;  %v438_v54 = vld [vmem:[#allocation5 + $0x790] sm:$0xff]  ;;  %v2447_v59 = vpack.c.bf16 %v421_v51, %v420_v49  ;;  %v444_v30 = vld [vmem:[#allocation5 + $0x7c0] sm:$0xff]  ;;  %v445_v31 = vld [vmem:[#allocation5 + $0x7c8] sm:$0xff] }
 0x115   :  { %2364 = vmatpush3.bf16.msra.mxu0 %v2363_v60  ;;  %v2417_v60 = vpack.c.bf16 %v407_v53, %v406_v52  ;;  %v2449_v0 = vpack.c.bf16 %v439_v55, %v438_v54  ;;  %v396_v35 = vld [vmem:[#allocation5 + $0x640] sm:$0xff]  ;;  %v397_v36 = vld [vmem:[#allocation5 + $0x648] sm:$0xff]  ;;  %v415_v41 = vld [vmem:[#allocation5 + $0x6d8] sm:$0xff] }
 0x116   :  { %2366 = vmatprep.subr.bf16.mxu0 %v2365_v62  ;;  %v391_v62 = vld [vmem:[#allocation5 + $0x618] sm:$0xff]  ;;  %v428_v37 = vld [vmem:[#allocation5 + $0x740] sm:$0xff]  ;;  %v429_v39 = vld [vmem:[#allocation5 + $0x748] sm:$0xff] }
 0x117   :  { %2396 = vmatpush3.bf16.msra.mxu1 %v2395_v61  ;;  %v390_v61 = vld [vmem:[#allocation5 + $0x610] sm:$0xff]  ;;  %v447_v43 = vld [vmem:[#allocation5 + $0x7d8] sm:$0xff]  ;;  %v416_v52 = vld [vmem:[#allocation5 + $0x6e0] sm:$0xff] }
 0x118   :  { %2398 = vmatprep.subr.bf16.mxu1 %v2397_v2  ;;  %v408_v2 = vld [vmem:[#allocation5 + $0x6a0] sm:$0xff]  ;;  %v2419_v7 = vpack.c.bf16 %v391_v62, %v390_v61  ;;  %v446_v42 = vld [vmem:[#allocation5 + $0x7d0] sm:$0xff]  ;;  %v399_v48 = vld [vmem:[#allocation5 + $0x658] sm:$0xff] }
 0x119   :  { %2368 = vmatpush3.bf16.msra.mxu0 %v2367_v8  ;;  %v187_v8 = vld [vmem:[#allocation2 + $0x78] sm:$0xff]  ;;  %v398_v47 = vld [vmem:[#allocation5 + $0x650] sm:$0xff]  ;;  %v417_v53 = vld [vmem:[#allocation5 + $0x6e8] sm:$0xff] }
 0x11a   :  { %2370 = vmatprep.subr.bf16.mxu0 %v2369_v10  ;;  %v2421_v10 = vpack.c.bf16 %v409_v3, %v408_v2  ;;  %v430_v49 = vld [vmem:[#allocation5 + $0x750] sm:$0xff]  ;;  %v431_v51 = vld [vmem:[#allocation5 + $0x758] sm:$0xff]  ;;  %v448_v54 = vld [vmem:[#allocation5 + $0x7e0] sm:$0xff] }
 0x11b   :  { %2400 = vmatpush3.bf16.msra.mxu1 %v2399_v9  ;;  %v2451_v9 = vpack.c.bf16 %v423_v1, %v422_v63  ;;  %v449_v55 = vld [vmem:[#allocation5 + $0x7e8] sm:$0xff]  ;;  %v432_v61 = vld [vmem:[#allocation5 + $0x760] sm:$0xff]  ;;  %v419_v1 = vld [vmem:[#allocation5 + $0x6f8] sm:$0xff] }
 0x11c   :  { %2402 = vmatprep.subr.bf16.mxu1 %v2401_v14  ;;  %v2453_v14 = vpack.c.bf16 %v441_v5, %v440_v4  ;;  %v2469_v62 = vpack.c.bf16 %v449_v55, %v448_v54  ;;  %v433_v63 = vld [vmem:[#allocation5 + $0x768] sm:$0xff]  ;;  %v450_v2 = vld [vmem:[#allocation5 + $0x7f0] sm:$0xff]  ;;  %v451_v3 = vld [vmem:[#allocation5 + $0x7f8] sm:$0xff] }
 0x11d   :  { %2372 = vmatpush3.bf16.msra.mxu0 %v2371_v20  ;;  %v2423_v20 = vpack.c.bf16 %v393_v12, %v392_v11  ;;  %v2471_v5 = vpack.c.bf16 %v433_v63, %v432_v61  ;;  %v435_v11 = vld [vmem:[#allocation5 + $0x778] sm:$0xff]  ;;  %v468_v12 = vld [vmem:[#allocation5 + $0x880] sm:$0xff]  ;;  %v506_v54 = vld [vmem:[#allocation5 + $0x9b0] sm:$0xff] }
 0x11e   :  { %2374 = vmatprep.subr.bf16.mxu0 %v2373_v22  ;;  %v2425_v22 = vpack.c.bf16 %v411_v17, %v410_v16  ;;  %v507_v55 = vld [vmem:[#allocation5 + $0x9b8] sm:$0xff]  ;;  %v490_v61 = vld [vmem:[#allocation5 + $0x930] sm:$0xff] }
 0x11f   :  { %2404 = vmatpush3.bf16.msra.mxu1 %v2403_v21  ;;  %v2455_v21 = vpack.c.bf16 %v425_v15, %v424_v13  ;;  %v469_v13 = vld [vmem:[#allocation5 + $0x888] sm:$0xff]  ;;  %v491_v63 = vld [vmem:[#allocation5 + $0x938] sm:$0xff] }
 0x120   :  { %2406 = vmatprep.subr.bf16.mxu1 %v2405_v26  ;;  %v2457_v26 = vpack.c.bf16 %v443_v19, %v442_v18  ;;  %v501_v15 = vld [vmem:[#allocation5 + $0x988] sm:$0xff]  ;;  %v2477_v18 = vpack.c.bf16 %v469_v13, %v468_v12  ;;  %v452_v19 = vld [vmem:[#allocation5 + $0x800] sm:$0xff]  ;;  %v478_v12 = vld [vmem:[#allocation5 + $0x8d0] sm:$0xff] }
 0x121   :  { %2376 = vmatpush3.bf16.msra.mxu0 %v2375_v32  ;;  %v2427_v32 = vpack.c.bf16 %v395_v24, %v394_v23  ;;  %v485_v23 = vld [vmem:[#allocation5 + $0x908] sm:$0xff]  ;;  %v470_v24 = vld [vmem:[#allocation5 + $0x890] sm:$0xff]  ;;  %v479_v13 = vld [vmem:[#allocation5 + $0x8d8] sm:$0xff] }
 0x122   :  { %2378 = vmatprep.subr.bf16.mxu0 %v2377_v34  ;;  %v2429_v34 = vpack.c.bf16 %v413_v29, %v412_v28  ;;  %v184_v28 = vld [vmem:[#allocation2 + $0x60] sm:$0xff] }
 0x123   :  { %2408 = vmatpush3.bf16.msra.mxu1 %v2407_v33  ;;  %v2459_v33 = vpack.c.bf16 %v427_v27, %v426_v25  ;;  %v471_v25 = vld [vmem:[#allocation5 + $0x898] sm:$0xff] }
 0x124   :  { %2410 = vmatprep.subr.bf16.mxu1 %v2409_v38  ;;  %v2461_v38 = vpack.c.bf16 %v445_v31, %v444_v30  ;;  %v503_v27 = vld [vmem:[#allocation5 + $0x998] sm:$0xff]  ;;  %v186_v30 = vld [vmem:[#allocation2 + $0x70] sm:$0xff] }
 0x125   :  { %2380 = vmatpush3.bf16.msra.mxu0 %v2379_v44  ;;  %v2431_v44 = vpack.c.bf16 %v397_v36, %v396_v35  ;;  %v486_v35 = vld [vmem:[#allocation5 + $0x910] sm:$0xff] }
 0x126   :  { %2414 = vmatprep.subr.bf16.mxu0 %v2413_v46  ;;  %v2433_v46 = vpack.c.bf16 %v415_v41, %v414_v40  ;;  %v504_v40 = vld [vmem:[#allocation5 + $0x9a0] sm:$0xff]  ;;  %v505_v41 = vld [vmem:[#allocation5 + $0x9a8] sm:$0xff] }
 0x127   :  { %2412 = vmatpush3.bf16.msra.mxu1 %v2411_v45  ;;  %v2463_v45 = vpack.c.bf16 %v429_v39, %v428_v37  ;;  %v487_v37 = vld [vmem:[#allocation5 + $0x918] sm:$0xff]  ;;  %v473_v39 = vld [vmem:[#allocation5 + $0x8a8] sm:$0xff] }
 0x128   :  { %2446 = vmatprep.subr.bf16.mxu1 %v2445_v50  ;;  %932 = vmatmul.mubr.f32.vlgmr.msra.gmra.mrb[4].mxu0 %v180_v56  ;;  %v2465_v50 = vpack.c.bf16 %v447_v43, %v446_v42  ;;  %v2435_v56 = vpack.c.bf16 %v399_v48, %v398_v47  ;;  %v189_v42 = vld [vmem:[#allocation2 + $0x88] sm:$0xff]  ;;  %v456_v47 = vld [vmem:[#allocation5 + $0x820] sm:$0xff] }
 0x129   :  { %2416 = vmatpush3.bf16.msra.mxu0 %v2415_v57  ;;  %1071 = vmatprep.mubr.f32.mxu0 %v185_v6  ;;  %v2467_v57 = vpack.c.bf16 %v431_v51, %v430_v49  ;;  %v457_v48 = vld [vmem:[#allocation5 + $0x828] sm:$0xff]  ;;  %v488_v49 = vld [vmem:[#allocation5 + $0x920] sm:$0xff] }
 0x12a   :  { %1002 = vmatmul.mubr.f32.vlgmr.msra.gmra.mrb[4].mxu1 %v182_v58  ;;  %2418 = vmatprep.subr.bf16.mxu0 %v2417_v60  ;;  %v2437_v58 = vpack.c.bf16 %v417_v53, %v416_v52  ;;  %v401_v60 = vld [vmem:[#allocation5 + $0x668] sm:$0xff]  ;;  %v474_v52 = vld [vmem:[#allocation5 + $0x8b0] sm:$0xff]  ;;  %v475_v53 = vld [vmem:[#allocation5 + $0x8b8] sm:$0xff] }
 0x12b   :  { %2448 = vmatpush3.bf16.msra.mxu1 %v2447_v59  ;;  %1141 = vmatprep.mubr.f32.mxu1 %v187_v8  ;;  %v400_v59 = vld [vmem:[#allocation5 + $0x660] sm:$0xff]  ;;  %v403_v8 = vld [vmem:[#allocation5 + $0x678] sm:$0xff]  ;;  %v489_v51 = vld [vmem:[#allocation5 + $0x928] sm:$0xff] }
 0x12c   :  { %2450 = vmatprep.subr.bf16.mxu1 %v2449_v0  ;;  %v418_v0 = vld [vmem:[#allocation5 + $0x6f0] sm:$0xff]  ;;  %v2439_v4 = vpack.c.bf16 %v401_v60, %v400_v59  ;;  %v459_v60 = vld [vmem:[#allocation5 + $0x838] sm:$0xff] }
 0x12d   :  { %2420 = vmatpush3.bf16.msra.mxu0 %v2419_v7  ;;  %v2441_v6 = vpack.c.bf16 %v419_v1, %v418_v0  ;;  %v402_v7 = vld [vmem:[#allocation5 + $0x670] sm:$0xff]  ;;  %v476_v0 = vld [vmem:[#allocation5 + $0x8c0] sm:$0xff]  ;;  %v477_v1 = vld [vmem:[#allocation5 + $0x8c8] sm:$0xff] }
 0x12e   :  { %2422 = vmatprep.subr.bf16.mxu0 %v2421_v10  ;;  %v2473_v10 = vpack.c.bf16 %v451_v3, %v450_v2  ;;  %v2443_v16 = vpack.c.bf16 %v403_v8, %v402_v7  ;;  %v458_v59 = vld [vmem:[#allocation5 + $0x830] sm:$0xff]  ;;  %v508_v2 = vld [vmem:[#allocation5 + $0x9c0] sm:$0xff]  ;;  %v509_v3 = vld [vmem:[#allocation5 + $0x9c8] sm:$0xff] }
 0x12f   :  { %2452 = vmatpush3.bf16.msra.mxu1 %v2451_v9  ;;  %v434_v9 = vld [vmem:[#allocation5 + $0x770] sm:$0xff]  ;;  %v460_v7 = vld [vmem:[#allocation5 + $0x840] sm:$0xff]  ;;  %v461_v8 = vld [vmem:[#allocation5 + $0x848] sm:$0xff] }
 0x130   :  { %2454 = vmatprep.subr.bf16.mxu1 %v2453_v14  ;;  %v500_v14 = vld [vmem:[#allocation5 + $0x980] sm:$0xff]  ;;  %v2475_v17 = vpack.c.bf16 %v435_v11, %v434_v9  ;;  %v493_v11 = vld [vmem:[#allocation5 + $0x948] sm:$0xff] }
 0x131   :  { %2424 = vmatpush3.bf16.msra.mxu0 %v2423_v20  ;;  %v453_v20 = vld [vmem:[#allocation5 + $0x808] sm:$0xff]  ;;  %v492_v9 = vld [vmem:[#allocation5 + $0x940] sm:$0xff] }
 0x132   :  { %2426 = vmatprep.subr.bf16.mxu0 %v2425_v22  ;;  %v2509_v22 = vpack.c.bf16 %v501_v15, %v500_v14  ;;  %v2479_v29 = vpack.c.bf16 %v453_v20, %v452_v19  ;;  %v510_v14 = vld [vmem:[#allocation5 + $0x9d0] sm:$0xff]  ;;  %v511_v15 = vld [vmem:[#allocation5 + $0x9d8] sm:$0xff] }
 0x133   :  { %2456 = vmatpush3.bf16.msra.mxu1 %v2455_v21  ;;  %v484_v21 = vld [vmem:[#allocation5 + $0x900] sm:$0xff]  ;;  %v462_v19 = vld [vmem:[#allocation5 + $0x850] sm:$0xff]  ;;  %v463_v20 = vld [vmem:[#allocation5 + $0x858] sm:$0xff] }
 0x134   :  { %2458 = vmatprep.subr.bf16.mxu1 %v2457_v26  ;;  %v502_v26 = vld [vmem:[#allocation5 + $0x990] sm:$0xff]  ;;  %v2511_v31 = vpack.c.bf16 %v485_v23, %v484_v21  ;;  %v495_v23 = vld [vmem:[#allocation5 + $0x958] sm:$0xff] }
 0x135   :  { %2428 = vmatpush3.bf16.msra.mxu0 %v2427_v32  ;;  %v2481_v32 = vpack.c.bf16 %v471_v25, %v470_v24  ;;  %v2513_v36 = vpack.c.bf16 %v503_v27, %v502_v26  ;;  %v494_v21 = vld [vmem:[#allocation5 + $0x950] sm:$0xff]  ;;  %v480_v24 = vld [vmem:[#allocation5 + $0x8e0] sm:$0xff]  ;;  %v481_v25 = vld [vmem:[#allocation5 + $0x8e8] sm:$0xff] }
 0x136   :  { %2430 = vmatprep.subr.bf16.mxu0 %v2429_v34  ;;  %v455_v34 = vld [vmem:[#allocation5 + $0x818] sm:$0xff]  ;;  %v512_v26 = vld [vmem:[#allocation5 + $0x9e0] sm:$0xff]  ;;  %v513_v27 = vld [vmem:[#allocation5 + $0x9e8] sm:$0xff] }
 0x137   :  { %2460 = vmatpush3.bf16.msra.mxu1 %v2459_v33  ;;  %v454_v33 = vld [vmem:[#allocation5 + $0x810] sm:$0xff] }
 0x138   :  { %2462 = vmatprep.subr.bf16.mxu1 %v2461_v38  ;;  %v472_v38 = vld [vmem:[#allocation5 + $0x8a0] sm:$0xff]  ;;  %v2483_v43 = vpack.c.bf16 %v455_v34, %v454_v33  ;;  %v2533_v34 = vpack.c.bf16 %v513_v27, %v512_v26  ;;  %v570_v26 = vld [vmem:[#allocation5 + $0xbb0] sm:$0xff]  ;;  %v571_v27 = vld [vmem:[#allocation5 + $0xbb8] sm:$0xff] }
 0x139   :  { %2432 = vmatpush3.bf16.msra.mxu0 %v2431_v44  ;;  %v191_v44 = vld [vmem:[#allocation2 + $0x98] sm:$0xff]  ;;  %v496_v33 = vld [vmem:[#allocation5 + $0x960] sm:$0xff] }
 0x13a   :  { %2434 = vmatprep.subr.bf16.mxu0 %v2433_v46  ;;  %v2485_v46 = vpack.c.bf16 %v473_v39, %v472_v38  ;;  %v514_v38 = vld [vmem:[#allocation5 + $0x9f0] sm:$0xff]  ;;  %v515_v39 = vld [vmem:[#allocation5 + $0x9f8] sm:$0xff] }
 0x13b   :  { %2464 = vmatpush3.bf16.msra.mxu1 %v2463_v45  ;;  %v2515_v45 = vpack.c.bf16 %v487_v37, %v486_v35  ;;  %v497_v35 = vld [vmem:[#allocation5 + $0x968] sm:$0xff]  ;;  %v483_v37 = vld [vmem:[#allocation5 + $0x8f8] sm:$0xff] }
 0x13c   :  { %2466 = vmatprep.subr.bf16.mxu1 %v2465_v50  ;;  %v2517_v50 = vpack.c.bf16 %v505_v41, %v504_v40  ;;  %v2535_v41 = vpack.c.bf16 %v497_v35, %v496_v33  ;;  %v554_v33 = vld [vmem:[#allocation5 + $0xb30] sm:$0xff]  ;;  %v555_v35 = vld [vmem:[#allocation5 + $0xb38] sm:$0xff] }
 0x13d   :  { %2436 = vmatpush3.bf16.msra.mxu0 %v2435_v56  ;;  %v2487_v56 = vpack.c.bf16 %v457_v48, %v456_v47  ;;  %v499_v47 = vld [vmem:[#allocation5 + $0x978] sm:$0xff]  ;;  %v532_v48 = vld [vmem:[#allocation5 + $0xa80] sm:$0xff] }
 0x13e   :  { %2438 = vmatprep.subr.bf16.mxu0 %v2437_v58  ;;  %v2489_v58 = vpack.c.bf16 %v475_v53, %v474_v52 }
 0x13f   :  { %2468 = vmatpush3.bf16.msra.mxu1 %v2467_v57  ;;  %v2519_v57 = vpack.c.bf16 %v489_v51, %v488_v49  ;;  %v533_v49 = vld [vmem:[#allocation5 + $0xa88] sm:$0xff] }
 0x140   :  { %2470 = vmatprep.subr.bf16.mxu1 %v2469_v62  ;;  %v2521_v62 = vpack.c.bf16 %v507_v55, %v506_v54  ;;  %v565_v51 = vld [vmem:[#allocation5 + $0xb88] sm:$0xff]  ;;  %v2541_v54 = vpack.c.bf16 %v533_v49, %v532_v48  ;;  %v516_v55 = vld [vmem:[#allocation5 + $0xa00] sm:$0xff]  ;;  %v542_v48 = vld [vmem:[#allocation5 + $0xad0] sm:$0xff] }
 0x141   :  { %2440 = vmatpush3.bf16.msra.mxu0 %v2439_v4  ;;  %v2491_v4 = vpack.c.bf16 %v459_v60, %v458_v59  ;;  %v549_v59 = vld [vmem:[#allocation5 + $0xb08] sm:$0xff]  ;;  %v534_v60 = vld [vmem:[#allocation5 + $0xa90] sm:$0xff]  ;;  %v543_v49 = vld [vmem:[#allocation5 + $0xad8] sm:$0xff] }
 0x142   :  { %2442 = vmatprep.subr.bf16.mxu0 %v2441_v6  ;;  %v2493_v6 = vpack.c.bf16 %v477_v1, %v476_v0  ;;  %v188_v0 = vld [vmem:[#allocation2 + $0x80] sm:$0xff] }
 0x143   :  { %2472 = vmatpush3.bf16.msra.mxu1 %v2471_v5  ;;  %v2523_v5 = vpack.c.bf16 %v491_v63, %v490_v61  ;;  %v535_v61 = vld [vmem:[#allocation5 + $0xa98] sm:$0xff] }
 0x144   :  { %2474 = vmatprep.subr.bf16.mxu1 %v2473_v10  ;;  %v2525_v10 = vpack.c.bf16 %v509_v3, %v508_v2  ;;  %v567_v63 = vld [vmem:[#allocation5 + $0xb98] sm:$0xff]  ;;  %v190_v2 = vld [vmem:[#allocation2 + $0x90] sm:$0xff] }
 0x145   :  { %2444 = vmatpush3.bf16.msra.mxu0 %v2443_v16  ;;  %v2495_v16 = vpack.c.bf16 %v461_v8, %v460_v7  ;;  %v550_v7 = vld [vmem:[#allocation5 + $0xb10] sm:$0xff] }
 0x146   :  { %2478 = vmatprep.subr.bf16.mxu0 %v2477_v18  ;;  %v2497_v18 = vpack.c.bf16 %v479_v13, %v478_v12  ;;  %v568_v12 = vld [vmem:[#allocation5 + $0xba0] sm:$0xff]  ;;  %v569_v13 = vld [vmem:[#allocation5 + $0xba8] sm:$0xff] }
 0x147   :  { %2476 = vmatpush3.bf16.msra.mxu1 %v2475_v17  ;;  %v2527_v17 = vpack.c.bf16 %v493_v11, %v492_v9  ;;  %v551_v9 = vld [vmem:[#allocation5 + $0xb18] sm:$0xff]  ;;  %v537_v11 = vld [vmem:[#allocation5 + $0xaa8] sm:$0xff] }
 0x148   :  { %2510 = vmatprep.subr.bf16.mxu1 %v2509_v22  ;;  %1072 = vmatmul.mubr.f32.vlgmr.msra.gmra.mrb[6].mxu0 %v184_v28  ;;  %v2529_v22 = vpack.c.bf16 %v511_v15, %v510_v14  ;;  %v2499_v28 = vpack.c.bf16 %v463_v20, %v462_v19  ;;  %v193_v14 = vld [vmem:[#allocation2 + $0xa8] sm:$0xff]  ;;  %v520_v19 = vld [vmem:[#allocation5 + $0xa20] sm:$0xff] }
 0x149   :  { %2480 = vmatpush3.bf16.msra.mxu0 %v2479_v29  ;;  %1211 = vmatprep.mubr.f32.mxu0 %v189_v42  ;;  %v2531_v29 = vpack.c.bf16 %v495_v23, %v494_v21  ;;  %v521_v20 = vld [vmem:[#allocation5 + $0xa28] sm:$0xff]  ;;  %v552_v21 = vld [vmem:[#allocation5 + $0xb20] sm:$0xff] }
 0x14a   :  { %1142 = vmatmul.mubr.f32.vlgmr.msra.gmra.mrb[6].mxu1 %v186_v30  ;;  %2482 = vmatprep.subr.bf16.mxu0 %v2481_v32  ;;  %v2501_v30 = vpack.c.bf16 %v481_v25, %v480_v24  ;;  %v465_v32 = vld [vmem:[#allocation5 + $0x868] sm:$0xff]  ;;  %v538_v24 = vld [vmem:[#allocation5 + $0xab0] sm:$0xff]  ;;  %v539_v25 = vld [vmem:[#allocation5 + $0xab8] sm:$0xff] }
 0x14b   :  { %2512 = vmatpush3.bf16.msra.mxu1 %v2511_v31  ;;  %1281 = vmatprep.mubr.f32.mxu1 %v191_v44  ;;  %v464_v31 = vld [vmem:[#allocation5 + $0x860] sm:$0xff]  ;;  %v467_v44 = vld [vmem:[#allocation5 + $0x878] sm:$0xff]  ;;  %v553_v23 = vld [vmem:[#allocation5 + $0xb28] sm:$0xff] }
 0x14c   :  { %2514 = vmatprep.subr.bf16.mxu1 %v2513_v36  ;;  %v482_v36 = vld [vmem:[#allocation5 + $0x8f0] sm:$0xff]  ;;  %v2503_v40 = vpack.c.bf16 %v465_v32, %v464_v31  ;;  %v523_v32 = vld [vmem:[#allocation5 + $0xa38] sm:$0xff] }
 0x14d   :  { %2484 = vmatpush3.bf16.msra.mxu0 %v2483_v43  ;;  %v2505_v42 = vpack.c.bf16 %v483_v37, %v482_v36  ;;  %v466_v43 = vld [vmem:[#allocation5 + $0x870] sm:$0xff]  ;;  %v540_v36 = vld [vmem:[#allocation5 + $0xac0] sm:$0xff]  ;;  %v541_v37 = vld [vmem:[#allocation5 + $0xac8] sm:$0xff] }
 0x14e   :  { %2486 = vmatprep.subr.bf16.mxu0 %v2485_v46  ;;  %v2537_v46 = vpack.c.bf16 %v515_v39, %v514_v38  ;;  %v2507_v52 = vpack.c.bf16 %v467_v44, %v466_v43  ;;  %v522_v31 = vld [vmem:[#allocation5 + $0xa30] sm:$0xff]  ;;  %v572_v38 = vld [vmem:[#allocation5 + $0xbc0] sm:$0xff]  ;;  %v573_v39 = vld [vmem:[#allocation5 + $0xbc8] sm:$0xff] }
 0x14f   :  { %2516 = vmatpush3.bf16.msra.mxu1 %v2515_v45  ;;  %v498_v45 = vld [vmem:[#allocation5 + $0x970] sm:$0xff]  ;;  %v524_v43 = vld [vmem:[#allocation5 + $0xa40] sm:$0xff]  ;;  %v525_v44 = vld [vmem:[#allocation5 + $0xa48] sm:$0xff] }
 0x150   :  { %2518 = vmatprep.subr.bf16.mxu1 %v2517_v50  ;;  %v564_v50 = vld [vmem:[#allocation5 + $0xb80] sm:$0xff]  ;;  %v2539_v53 = vpack.c.bf16 %v499_v47, %v498_v45  ;;  %v557_v47 = vld [vmem:[#allocation5 + $0xb48] sm:$0xff] }
 0x151   :  { %2488 = vmatpush3.bf16.msra.mxu0 %v2487_v56  ;;  %v517_v56 = vld [vmem:[#allocation5 + $0xa08] sm:$0xff]  ;;  %v556_v45 = vld [vmem:[#allocation5 + $0xb40] sm:$0xff] }
 0x152   :  { %2490 = vmatprep.subr.bf16.mxu0 %v2489_v58  ;;  %v2573_v58 = vpack.c.bf16 %v565_v51, %v564_v50  ;;  %v2543_v1 = vpack.c.bf16 %v517_v56, %v516_v55  ;;  %v574_v50 = vld [vmem:[#allocation5 + $0xbd0] sm:$0xff]  ;;  %v575_v51 = vld [vmem:[#allocation5 + $0xbd8] sm:$0xff] }
 0x153   :  { %2520 = vmatpush3.bf16.msra.mxu1 %v2519_v57  ;;  %v548_v57 = vld [vmem:[#allocation5 + $0xb00] sm:$0xff]  ;;  %v526_v55 = vld [vmem:[#allocation5 + $0xa50] sm:$0xff]  ;;  %v527_v56 = vld [vmem:[#allocation5 + $0xa58] sm:$0xff] }
 0x154   :  { %2522 = vmatprep.subr.bf16.mxu1 %v2521_v62  ;;  %v566_v62 = vld [vmem:[#allocation5 + $0xb90] sm:$0xff]  ;;  %v2575_v3 = vpack.c.bf16 %v549_v59, %v548_v57  ;;  %v559_v59 = vld [vmem:[#allocation5 + $0xb58] sm:$0xff] }
 0x155   :  { %2492 = vmatpush3.bf16.msra.mxu0 %v2491_v4  ;;  %v2545_v4 = vpack.c.bf16 %v535_v61, %v534_v60  ;;  %v2577_v8 = vpack.c.bf16 %v567_v63, %v566_v62  ;;  %v558_v57 = vld [vmem:[#allocation5 + $0xb50] sm:$0xff]  ;;  %v544_v60 = vld [vmem:[#allocation5 + $0xae0] sm:$0xff]  ;;  %v545_v61 = vld [vmem:[#allocation5 + $0xae8] sm:$0xff] }
 0x156   :  { %2494 = vmatprep.subr.bf16.mxu0 %v2493_v6  ;;  %v519_v6 = vld [vmem:[#allocation5 + $0xa18] sm:$0xff]  ;;  %v576_v62 = vld [vmem:[#allocation5 + $0xbe0] sm:$0xff]  ;;  %v577_v63 = vld [vmem:[#allocation5 + $0xbe8] sm:$0xff] }
 0x157   :  { %2524 = vmatpush3.bf16.msra.mxu1 %v2523_v5  ;;  %v518_v5 = vld [vmem:[#allocation5 + $0xa10] sm:$0xff] }
 0x158   :  { %2526 = vmatprep.subr.bf16.mxu1 %v2525_v10  ;;  %v536_v10 = vld [vmem:[#allocation5 + $0xaa0] sm:$0xff]  ;;  %v2547_v15 = vpack.c.bf16 %v519_v6, %v518_v5  ;;  %v2597_v6 = vpack.c.bf16 %v577_v63, %v576_v62 }
 0x159   :  { %2496 = vmatpush3.bf16.msra.mxu0 %v2495_v16  ;;  %v195_v16 = vld [vmem:[#allocation2 + $0xb8] sm:$0xff]  ;;  %v560_v5 = vld [vmem:[#allocation5 + $0xb60] sm:$0xff] }
 0x15a   :  { %2498 = vmatprep.subr.bf16.mxu0 %v2497_v18  ;;  %v2549_v18 = vpack.c.bf16 %v537_v11, %v536_v10  ;;  %v578_v10 = vld [vmem:[#allocation5 + $0xbf0] sm:$0xff]  ;;  %v579_v11 = vld [vmem:[#allocation5 + $0xbf8] sm:$0xff] }
 0x15b   :  { %2528 = vmatpush3.bf16.msra.mxu1 %v2527_v17  ;;  %v2579_v17 = vpack.c.bf16 %v551_v9, %v550_v7  ;;  %v561_v7 = vld [vmem:[#allocation5 + $0xb68] sm:$0xff]  ;;  %v547_v9 = vld [vmem:[#allocation5 + $0xaf8] sm:$0xff] }
 0x15c   :  { %2530 = vmatprep.subr.bf16.mxu1 %v2529_v22  ;;  %v2581_v22 = vpack.c.bf16 %v569_v13, %v568_v12  ;;  %v2599_v13 = vpack.c.bf16 %v561_v7, %v560_v5  ;;  %v1481_v5 = vld [vmem:[#allocation11 + $0xd8] sm:$0xff] }
 0x15d   :  { %2500 = vmatpush3.bf16.msra.mxu0 %v2499_v28  ;;  %v2551_v28 = vpack.c.bf16 %v521_v20, %v520_v19  ;;  %v563_v19 = vld [vmem:[#allocation5 + $0xb78] sm:$0xff] }
 0x15e   :  { %2502 = vmatprep.subr.bf16.mxu0 %v2501_v30  ;;  %v2553_v30 = vpack.c.bf16 %v539_v25, %v538_v24  ;;  %v1720_v25 = vld [vmem:[#allocation7] ss:$0 sm:$0xff] }
 0x15f   :  { %2532 = vmatpush3.bf16.msra.mxu1 %v2531_v29  ;;  %v2583_v29 = vpack.c.bf16 %v553_v23, %v552_v21  ;;  %v194_v23 = vld [vmem:[#allocation2 + $0xb0] sm:$0xff] }
 0x160   :  { %2534 = vmatprep.subr.bf16.mxu1 %v2533_v34  ;;  %v2585_v34 = vpack.c.bf16 %v571_v27, %v570_v26 }
 0x161   :  { %2504 = vmatpush3.bf16.msra.mxu0 %v2503_v40  ;;  %v2555_v40 = vpack.c.bf16 %v523_v32, %v522_v31 }
 0x162   :  { %2506 = vmatprep.subr.bf16.mxu0 %v2505_v42  ;;  %v2557_v42 = vpack.c.bf16 %v541_v37, %v540_v36  ;;  %v1455_v37 = vld [vmem:[#allocation11 + $0x8] sm:$0xff] }
 0x163   :  { %2536 = vmatpush3.bf16.msra.mxu1 %v2535_v41  ;;  %v2587_v41 = vpack.c.bf16 %v555_v35, %v554_v33  ;;  %v1470_v33 = vld [vmem:[#allocation11 + $0x80] sm:$0xff] }
 0x164   :  { %2538 = vmatprep.subr.bf16.mxu1 %v2537_v46  ;;  %v2589_v46 = vpack.c.bf16 %v573_v39, %v572_v38  ;;  %v1454_v35 = vld [vmem:[#allocation11] sm:$0xff]  ;;  %v1472_v38 = vld [vmem:[#allocation11 + $0x90] sm:$0xff]  ;;  %v1473_v39 = vld [vmem:[#allocation11 + $0x98] sm:$0xff] }
 0x165   :  { %2508 = vmatpush3.bf16.msra.mxu0 %v2507_v52  ;;  %v2559_v52 = vpack.c.bf16 %v525_v44, %v524_v43  ;;  %v1457_v43 = vld [vmem:[#allocation11 + $0x18] sm:$0xff]  ;;  %v1474_v44 = vld [vmem:[#allocation11 + $0xa0] sm:$0xff] }
 0x166   :  { %2542 = vmatprep.subr.bf16.mxu0 %v2541_v54  ;;  %v2561_v54 = vpack.c.bf16 %v543_v49, %v542_v48  ;;  %v1458_v48 = vld [vmem:[#allocation11 + $0x20] sm:$0xff]  ;;  %v1459_v49 = vld [vmem:[#allocation11 + $0x28] sm:$0xff] }
 0x167   :  { %2540 = vmatpush3.bf16.msra.mxu1 %v2539_v53  ;;  %v2591_v53 = vpack.c.bf16 %v557_v47, %v556_v45  ;;  %v1475_v45 = vld [vmem:[#allocation11 + $0xa8] sm:$0xff] }
 0x168   :  { %2574 = vmatprep.subr.bf16.mxu1 %v2573_v58  ;;  %1212 = vmatmul.mubr.f32.vlgmr.msra.gmra.mrb[8].mxu0 %v188_v0  ;;  %v2593_v58 = vpack.c.bf16 %v575_v51, %v574_v50  ;;  %v2563_v0 = vpack.c.bf16 %v527_v56, %v526_v55  ;;  %v2613_v47 = vpack.c.bf16 %v1475_v45, %v1474_v44  ;;  %v1476_v50 = vld [vmem:[#allocation11 + $0xb0] sm:$0xff]  ;;  %v1477_v51 = vld [vmem:[#allocation11 + $0xb8] sm:$0xff] }
 0x169   :  { %2544 = vmatpush3.bf16.msra.mxu0 %v2543_v1  ;;  %1351 = vmatprep.mubr.f32.mxu0 %v193_v14  ;;  %v2595_v1 = vpack.c.bf16 %v559_v59, %v558_v57  ;;  %v1461_v55 = vld [vmem:[#allocation11 + $0x38] sm:$0xff]  ;;  %v1478_v57 = vld [vmem:[#allocation11 + $0xc0] sm:$0xff] }
 0x16a   :  { %1282 = vmatmul.mubr.f32.vlgmr.msra.gmra.mrb[8].mxu1 %v190_v2  ;;  %2546 = vmatprep.subr.bf16.mxu0 %v2545_v4  ;;  %v2565_v2 = vpack.c.bf16 %v545_v61, %v544_v60  ;;  %v529_v4 = vld [vmem:[#allocation5 + $0xa68] sm:$0xff] }
 0x16b   :  { %2576 = vmatpush3.bf16.msra.mxu1 %v2575_v3  ;;  %1421 = vmatprep.mubr.f32.mxu1 %v195_v16  ;;  %v528_v3 = vld [vmem:[#allocation5 + $0xa60] sm:$0xff]  ;;  %v531_v16 = vld [vmem:[#allocation5 + $0xa78] sm:$0xff]  ;;  %v1463_v61 = vld [vmem:[#allocation11 + $0x48] sm:$0xff] }
 0x16c   :  { %2578 = vmatprep.subr.bf16.mxu1 %v2577_v8  ;;  %v546_v8 = vld [vmem:[#allocation5 + $0xaf0] sm:$0xff]  ;;  %v2567_v12 = vpack.c.bf16 %v529_v4, %v528_v3  ;;  %v1462_v60 = vld [vmem:[#allocation11 + $0x40] sm:$0xff] }
 0x16d   :  { %2548 = vmatpush3.bf16.msra.mxu0 %v2547_v15  ;;  %v2569_v14 = vpack.c.bf16 %v547_v9, %v546_v8  ;;  %v530_v15 = vld [vmem:[#allocation5 + $0xa70] sm:$0xff]  ;;  %v2623_v63 = vpack.c.bf16 %v1463_v61, %v1462_v60  ;;  %v1465_v9 = vld [vmem:[#allocation11 + $0x58] sm:$0xff] }
 0x16e   :  { %2550 = vmatprep.subr.bf16.mxu0 %v2549_v18  ;;  %v562_v18 = vld [vmem:[#allocation5 + $0xb70] sm:$0xff]  ;;  %v2571_v20 = vpack.c.bf16 %v531_v16, %v530_v15  ;;  %v1466_v16 = vld [vmem:[#allocation11 + $0x60] sm:$0xff] }
 0x16f   :  { %2580 = vmatpush3.bf16.msra.mxu1 %v2579_v17  ;;  %v2601_v17 = vpack.c.bf16 %v579_v11, %v578_v10  ;;  %v2603_v21 = vpack.c.bf16 %v563_v19, %v562_v18  ;;  %v1480_v4 = vld [vmem:[#allocation11 + $0xd0] sm:$0xff] }
 0x170   :  { %2582 = vmatprep.subr.bf16.mxu1 %v2581_v22  ;;  %v192_v22 = vld [vmem:[#allocation2 + $0xa0] sm:$0xff]  ;;  %v2625_v7 = vpack.c.bf16 %v1481_v5, %v1480_v4  ;;  %v1464_v8 = vld [vmem:[#allocation11 + $0x50] sm:$0xff] }
 0x171   :  { %2552 = vmatpush3.bf16.msra.mxu0 %v2551_v28  ;;  %v2627_v11 = vpack.c.bf16 %v1465_v9, %v1464_v8  ;;  %v1484_v19 = vld [vmem:[#allocation11 + $0xf0] sm:$0xff] }
 0x172   :  { %2554 = vmatprep.subr.bf16.mxu0 %v2553_v30 }
 0x173   :  { %2584 = vmatpush3.bf16.msra.mxu1 %v2583_v29 }
 0x174   :  { %2586 = vmatprep.subr.bf16.mxu1 %v2585_v34  ;;  %v1471_v34 = vld [vmem:[#allocation11 + $0x88] sm:$0xff] }
 0x175   :  { %2556 = vmatpush3.bf16.msra.mxu0 %v2555_v40  ;;  %v2605_v36 = vpack.c.bf16 %v1471_v34, %v1470_v33  ;;  %v2607_v40 = vpack.c.bf16 %v1455_v37, %v1454_v35  ;;  %v1592_v34 = vld [vmem:[#allocation17 + $0x10] sm:$0xff]  ;;  %v1593_v35 = vld [vmem:[#allocation17 + $0x18] sm:$0xff]  ;;  %v1611_v37 = vld [vmem:[#allocation17 + $0xa8] sm:$0xff] }
 0x176   :  { %2558 = vmatprep.subr.bf16.mxu0 %v2557_v42  ;;  %v1456_v42 = vld [vmem:[#allocation11 + $0x10] sm:$0xff] }
 0x177   :  { %2588 = vmatpush3.bf16.msra.mxu1 %v2587_v41  ;;  %v2609_v41 = vpack.c.bf16 %v1473_v39, %v1472_v38  ;;  %v2643_v38 = vpack.c.bf16 %v1593_v35, %v1592_v34  ;;  %v1616_v34 = vld [vmem:[#allocation17 + $0xd0] sm:$0xff]  ;;  %v1617_v35 = vld [vmem:[#allocation17 + $0xd8] sm:$0xff] }
 0x178   :  { %2590 = vmatprep.subr.bf16.mxu1 %v2589_v46  ;;  %v2611_v46 = vpack.c.bf16 %v1457_v43, %v1456_v42  ;;  %v1612_v42 = vld [vmem:[#allocation17 + $0xb0] sm:$0xff]  ;;  %v1613_v43 = vld [vmem:[#allocation17 + $0xb8] sm:$0xff] }
 0x179   :  { %2560 = vmatpush3.bf16.msra.mxu0 %v2559_v52  ;;  %v2615_v52 = vpack.c.bf16 %v1459_v49, %v1458_v48  ;;  %v2649_v45 = vpack.c.bf16 %v1613_v43, %v1612_v42  ;;  %v1614_v48 = vld [vmem:[#allocation17 + $0xc0] sm:$0xff]  ;;  %v1615_v49 = vld [vmem:[#allocation17 + $0xc8] sm:$0xff] }
 0x17a   :  { %2562 = vmatprep.subr.bf16.mxu0 %v2561_v54  ;;  %v1460_v54 = vld [vmem:[#allocation11 + $0x30] sm:$0xff]  ;;  %v1602_v43 = vld [vmem:[#allocation17 + $0x60] sm:$0xff] }
 0x17b   :  { %2592 = vmatpush3.bf16.msra.mxu1 %v2591_v53  ;;  %v2617_v53 = vpack.c.bf16 %v1477_v51, %v1476_v50  ;;  %v2619_v56 = vpack.c.bf16 %v1461_v55, %v1460_v54  ;;  %v2653_v51 = vpack.c.bf16 %v1615_v49, %v1614_v48  ;;  %v1604_v49 = vld [vmem:[#allocation17 + $0x70] sm:$0xff] }
 0x17c   :  { %2594 = vmatprep.subr.bf16.mxu1 %v2593_v58  ;;  %v1479_v58 = vld [vmem:[#allocation11 + $0xc8] sm:$0xff] }
 0x17d   :  { %2564 = vmatpush3.bf16.msra.mxu0 %v2563_v0  ;;  %v2621_v59 = vpack.c.bf16 %v1479_v58, %v1478_v57 }
 0x17e   :  { %2566 = vmatprep.subr.bf16.mxu0 %v2565_v2 }
 0x17f   :  { %2596 = vmatpush3.bf16.msra.mxu1 %v2595_v1 }
 0x180   :  { %2598 = vmatprep.subr.bf16.mxu1 %v2597_v6 }
 0x181   :  { %2568 = vmatpush3.bf16.msra.mxu0 %v2567_v12 }
 0x182   :  { %2570 = vmatprep.subr.bf16.mxu0 %v2569_v14  ;;  %v1483_v14 = vld [vmem:[#allocation11 + $0xe8] sm:$0xff] }
 0x183   :  { %2600 = vmatpush3.bf16.msra.mxu1 %v2599_v13  ;;  %v1482_v13 = vld [vmem:[#allocation11 + $0xe0] sm:$0xff] }
 0x184   :  { %2602 = vmatprep.subr.bf16.mxu1 %v2601_v17  ;;  %v2629_v15 = vpack.c.bf16 %v1483_v14, %v1482_v13  ;;  %v1467_v17 = vld [vmem:[#allocation11 + $0x68] sm:$0xff] }
 0x185   :  { %2572 = vmatpush3.bf16.msra.mxu0 %v2571_v20  ;;  %v2631_v18 = vpack.c.bf16 %v1467_v17, %v1466_v16  ;;  %v1485_v20 = vld [vmem:[#allocation11 + $0xf8] sm:$0xff] }
 0x186   :  { %2606 = vmatprep.subr.bf16.mxu0 %v2605_v36  ;;  %v1610_v36 = vld [vmem:[#allocation17 + $0xa0] sm:$0xff] }
 0x187   :  { %2604 = vmatpush3.bf16.msra.mxu1 %v2603_v21  ;;  %v2633_v21 = vpack.c.bf16 %v1485_v20, %v1484_v19  ;;  %v2645_v39 = vpack.c.bf16 %v1611_v37, %v1610_v36  ;;  %v1721_v20 = vld [vmem:[#allocation8] ss:$0 sm:$0xff]  ;;  %v2657_v36 = vpack.c.bf16 %v1617_v35, %v1616_v34 }
 0x188   :  { %1352 = vmatmul.mubr.f32.vlgmr.msra.gmra.mrb[10].mxu0 %v192_v22  ;;  %v1468_v22 = vld [vmem:[#allocation11 + $0x70] sm:$0xff] }
 0x189   :  { %2608 = vmatpush3.bf16.msra.mxu0 %v2607_v40  ;;  %v1594_v40 = vld [vmem:[#allocation17 + $0x20] sm:$0xff]  ;;  %v1600_v37 = vld [vmem:[#allocation17 + $0x50] sm:$0xff] }
 0x18a   :  { %1422 = vmatmul.mubr.f32.vlgmr.msra.gmra.mrb[10].mxu1 %v194_v23  ;;  %2610 = vmatprep.subr.bf16.mxu0 %v2609_v41  ;;  %v1469_v23 = vld [vmem:[#allocation11 + $0x78] sm:$0xff]  ;;  %v1595_v41 = vld [vmem:[#allocation17 + $0x28] sm:$0xff] }
 0x18b   :  { %v2647_v44 = vpack.c.bf16 %v1595_v41, %v1594_v40  ;;  %v1618_v40 = vld [vmem:[#allocation17 + $0xe0] sm:$0xff]  ;;  %v1619_v41 = vld [vmem:[#allocation17 + $0xe8] sm:$0xff] }
 0x18c   :  { %v2661_v42 = vpack.c.bf16 %v1619_v41, %v1618_v40 }
 0x18d   :  { %2612 = vmatpush3.bf16.msra.mxu0 %v2611_v46  ;;  %v1596_v46 = vld [vmem:[#allocation17 + $0x30] sm:$0xff] }
 0x18e   :  { %2614 = vmatprep.subr.bf16.mxu0 %v2613_v47  ;;  %v1597_v47 = vld [vmem:[#allocation17 + $0x38] sm:$0xff] }
 0x18f   :  { %v2651_v50 = vpack.c.bf16 %v1597_v47, %v1596_v46  ;;  %v1620_v46 = vld [vmem:[#allocation17 + $0xf0] sm:$0xff]  ;;  %v1621_v47 = vld [vmem:[#allocation17 + $0xf8] sm:$0xff] }
 0x190   :  { %v2665_v48 = vpack.c.bf16 %v1621_v47, %v1620_v46 }
 0x191   :  { %2616 = vmatpush3.bf16.msra.mxu0 %v2615_v52 }
 0x192   :  { %2618 = vmatprep.subr.bf16.mxu0 %v2617_v53 }
 0x195   :  { %2620 = vmatpush3.bf16.msra.mxu0 %v2619_v56 }
 0x196   :  { %2622 = vmatprep.subr.bf16.mxu0 %v2621_v59 }
 0x199   :  { %2624 = vmatpush3.bf16.msra.mxu0 %v2623_v63 }
 0x19a   :  { %2626 = vmatprep.subr.bf16.mxu0 %v2625_v7 }
 0x19d   :  { %2628 = vmatpush3.bf16.msra.mxu0 %v2627_v11 }
 0x19e   :  { %2630 = vmatprep.subr.bf16.mxu0 %v2629_v15 }
 0x1a1   :  { %2632 = vmatpush3.bf16.msra.mxu0 %v2631_v18 }
 0x1a2   :  { %2634 = vmatprep.subr.bf16.mxu0 %v2633_v21  ;;  %v1723_v21 = vld [vmem:[#allocation8 + $0x1] ss:$0 sm:$0xff] }
 0x1bb   :  { %v1763_v24 = vpop.f32.mrb[0].mxu0 }
 0x1bc   :  { %v1764_v26 = vpop.f32.mrb[1].mxu0 }
 0x1bd   :  { %v1798_v27 = vpop.f32.mrb[0].mxu1  ;;  %v1765_v28 = vadd.f32 %v1764_v26, %v1763_v24  ;;  %v2635_v24 = vpack.c.bf16 %v1469_v23, %v1468_v22  ;;  %v1607_v26 = vld [vmem:[#allocation17 + $0x88] sm:$0xff]  ;;  %v1722_v23 = vld [vmem:[#allocation10] ss:$0 sm:$0xff] }
 0x1be   :  { %v1799_v29 = vpop.f32.mrb[1].mxu1 }
 0x1bf   :  { %v1800_v30 = vadd.f32 %v1799_v29, %v1798_v27  ;;  %v654_v31 = vadd.f32 %v1765_v28, %v1720_v25  ;;  %2636 = vmatpush3.bf16.msra.mxu0 %v2635_v24  ;;  %v1606_v25 = vld [vmem:[#allocation17 + $0x80] sm:$0xff]  ;;  %v1591_v29 = vld [vmem:[#allocation17 + $0x8] sm:$0xff]  ;;  %v1724_v24 = vld [vmem:[#allocation10 + $0x1] ss:$0 sm:$0xff] }
 0x1c0   :  { %v1590_v27 = vld [vmem:[#allocation17] sm:$0xff]  ;;  %v2637_v28 = vpack.c.bf16 %v1607_v26, %v1606_v25 }
 0x1c1   :  { %v724_v32 = vadd.f32 %v1800_v30, %v654_v31  ;;  %v1608_v30 = vld [vmem:[#allocation17 + $0x90] sm:$0xff]  ;;  %v1609_v31 = vld [vmem:[#allocation17 + $0x98] sm:$0xff] }
 0x1c2   :  { %v2641_v33 = vpack.c.bf16 %v1609_v31, %v1608_v30  ;;  %2638 = vmatprep.subr.bf16.mxu1 %v2637_v28  ;;  %v1598_v31 = vld [vmem:[#allocation17 + $0x40] sm:$0xff] }
 0x1db   :  { %v1833_v62 = vpop.f32.mrb[2].mxu0 }
 0x1dc   :  { %v1834_v0 = vpop.f32.mrb[3].mxu0 }
 0x1dd   :  { %v1868_v1 = vpop.f32.mrb[2].mxu1  ;;  %v1835_v2 = vadd.f32 %v1834_v0, %v1833_v62 }
 0x1de   :  { %v1869_v3 = vpop.f32.mrb[3].mxu1 }
 0x1df   :  { %v1870_v6 = vadd.f32 %v1869_v3, %v1868_v1  ;;  %v794_v10 = vadd.f32 %v1835_v2, %v724_v32  ;;  %v2639_v32 = vpack.c.bf16 %v1591_v29, %v1590_v27 }
 0x1e1   :  { %v864_v12 = vadd.f32 %v1870_v6, %v794_v10  ;;  %2640 = vmatpush3.bf16.msra.mxu1 %v2639_v32  ;;  %v1599_v32 = vld [vmem:[#allocation17 + $0x48] sm:$0xff] }
 0x1e2   :  { %2642 = vmatprep.subr.bf16.mxu1 %v2641_v33  ;;  %v2655_v33 = vpack.c.bf16 %v1599_v32, %v1598_v31 }
 0x1e5   :  { %2644 = vmatpush3.bf16.msra.mxu1 %v2643_v38  ;;  %v1601_v38 = vld [vmem:[#allocation17 + $0x58] sm:$0xff] }
 0x1e6   :  { %2646 = vmatprep.subr.bf16.mxu1 %v2645_v39  ;;  %v2659_v39 = vpack.c.bf16 %v1601_v38, %v1600_v37 }
 0x1e9   :  { %2648 = vmatpush3.bf16.msra.mxu1 %v2647_v44  ;;  %v1603_v44 = vld [vmem:[#allocation17 + $0x68] sm:$0xff] }
 0x1ea   :  { %2650 = vmatprep.subr.bf16.mxu1 %v2649_v45  ;;  %v2663_v45 = vpack.c.bf16 %v1603_v44, %v1602_v43 }
 0x1ed   :  { %2652 = vmatpush3.bf16.msra.mxu1 %v2651_v50  ;;  %v1605_v50 = vld [vmem:[#allocation17 + $0x78] sm:$0xff] }
 0x1ee   :  { %2654 = vmatprep.subr.bf16.mxu1 %v2653_v51  ;;  %v2667_v51 = vpack.c.bf16 %v1605_v50, %v1604_v49 }
 0x1f1   :  { %2656 = vmatpush3.bf16.msra.mxu1 %v2655_v33 }
 0x1f2   :  { %2658 = vmatprep.subr.bf16.mxu1 %v2657_v36 }
 0x1f5   :  { %2660 = vmatpush3.bf16.msra.mxu1 %v2659_v39 }
 0x1f6   :  { %2662 = vmatprep.subr.bf16.mxu1 %v2661_v42 }
 0x1f9   :  { %2664 = vmatpush3.bf16.msra.mxu1 %v2663_v45 }
 0x1fa   :  { %2666 = vmatprep.subr.bf16.mxu1 %v2665_v48 }
 0x1fb   :  { %v1903_v52 = vpop.f32.mrb[4].mxu0 }
 0x1fc   :  { %v1904_v53 = vpop.f32.mrb[5].mxu0 }
 0x1fd   :  { %v1938_v54 = vpop.f32.mrb[4].mxu1  ;;  %v1905_v55 = vadd.f32 %v1904_v53, %v1903_v52  ;;  %2668 = vmatpush3.bf16.msra.mxu1 %v2667_v51  ;;  %v1725_v53 = vld [vmem:[#allocation13] ss:$0 sm:$0xff] }
 0x1fe   :  { %v1939_v56 = vpop.f32.mrb[5].mxu1 }
 0x1ff   :  { %v1940_v57 = vadd.f32 %v1939_v56, %v1938_v54  ;;  %v934_v58 = vadd.f32 %v1905_v55, %v864_v12 }
 0x201   :  { %v1004_v59 = vadd.f32 %v1940_v57, %v934_v58  ;;  %v1726_v57 = vld [vmem:[#allocation14] ss:$0 sm:$0xff]  ;;  %v1728_v58 = vld [vmem:[#allocation14 + $0x1] ss:$0 sm:$0xff] }
 0x21b   :  { %v1973_v60 = vpop.f32.mrb[6].mxu0 }
 0x21c   :  { %v1974_v61 = vpop.f32.mrb[7].mxu0 }
 0x21d   :  { %v2008_v62 = vpop.f32.mrb[6].mxu1  ;;  %v1975_v63 = vadd.f32 %v1974_v61, %v1973_v60  ;;  %v1727_v60 = vld [vmem:[#allocation16] ss:$0 sm:$0xff]  ;;  %v1729_v61 = vld [vmem:[#allocation16 + $0x1] ss:$0 sm:$0xff] }
 0x21e   :  { %v2009_v0 = vpop.f32.mrb[7].mxu1 }
 0x21f   :  { %v2010_v1 = vadd.f32 %v2009_v0, %v2008_v62  ;;  %v1074_v2 = vadd.f32 %v1975_v63, %v1004_v59 }
 0x221   :  { %v1144_v3 = vadd.f32 %v2010_v1, %v1074_v2 }
 0x23b   :  { %v2043_v4 = vpop.f32.mrb[8].mxu0 }
 0x23c   :  { %v2044_v5 = vpop.f32.mrb[9].mxu0 }
 0x23d   :  { %v2078_v6 = vpop.f32.mrb[8].mxu1  ;;  %v2045_v7 = vadd.f32 %v2044_v5, %v2043_v4  ;;  %v1730_v5 = vld [vmem:[#allocation19] ss:$0 sm:$0xff] }
 0x23e   :  { %v2079_v8 = vpop.f32.mrb[9].mxu1 }
 0x23f   :  { %v2080_v9 = vadd.f32 %v2079_v8, %v2078_v6  ;;  %v1214_v10 = vadd.f32 %v2045_v7, %v1144_v3 }
 0x241   :  { %v1284_v11 = vadd.f32 %v2080_v9, %v1214_v10 }
 0x25b   :  { %v2113_v13 = vpop.f32.mrb[10].mxu0 }
 0x25c   :  { %v2114_v14 = vpop.f32.mrb[11].mxu0 }
 0x25d   :  { %v2148_v12 = vpop.f32.mrb[10].mxu1  ;;  %v2115_v15 = vadd.f32 %v2114_v14, %v2113_v13 }
 0x25e   :  { %v2149_v16 = vpop.f32.mrb[11].mxu1 }
 0x25f   :  { %v2150_v17 = vadd.f32 %v2149_v16, %v2148_v12  ;;  %v1354_v18 = vadd.f32 %v2115_v15, %v1284_v11 }
 0x261   :  { %v1424_v19 = vadd.f32 %v2150_v17, %v1354_v18 }
 0x263   :  { %v1427_v22 = vmax.f32 %v1424_v19, 0.0 }
 0x265   :  { %v1433_v25 = vmul.f32 %v1721_v20, %v1427_v22  ;;  %v1446_v26 = vmul.f32 %v1723_v21, %v1427_v22 }
 0x267   :  { %v1439_v27 = vadd.f32 %v1722_v23, %v1433_v25  ;;  %v1452_v28 = vadd.f32 %v1724_v24, %v1446_v26 }
 0x269   :  { %v1453_v29 = vmax.f32 %v1452_v28, 0.0  ;;  %v1440_v30 = vmax.f32 %v1439_v27, 0.0 }
 0x26b   :  { %1557 = vmatprep.mubr.f32.mxu0 %v1453_v29 }
 0x26c   :  { %1558 = vmatmul.mubr.f32.vlgmr.msra.gmra.mrb[12].mxu0 %v1440_v30 }
 0x33f   :  { %v2183_v52 = vpop.f32.mrb[12].mxu0 }
 0x340   :  { %v2184_v54 = vpop.f32.mrb[13].mxu0 }
 0x341   :  { %v2185_v55 = vadd.f32 %v2184_v54, %v2183_v52 }
 0x343   :  { %v1560_v56 = vadd.f32 %v2185_v55, %v1725_v53 }
 0x345   :  { %v1563_v59 = vmax.f32 %v1560_v56, 0.0 }
 0x347   :  { %v1569_v62 = vmul.f32 %v1726_v57, %v1563_v59  ;;  %v1582_v63 = vmul.f32 %v1728_v58, %v1563_v59 }
 0x349   :  { %v1575_v0 = vadd.f32 %v1727_v60, %v1569_v62  ;;  %v1588_v1 = vadd.f32 %v1729_v61, %v1582_v63 }
 0x34b   :  { %v1589_v2 = vmax.f32 %v1588_v1, 0.0  ;;  %v1576_v3 = vmax.f32 %v1575_v0, 0.0 }
 0x34d   :  { %1693 = vmatprep.mubr.f32.mxu1 %v1589_v2 }
 0x34e   :  { %1694 = vmatmul.mubr.f32.vlgmr.msra.gmra.mrb[12].mxu1 %v1576_v3 }
 0x421   :  { %v2218_v4 = vpop.f32.mrb[12].mxu1 }
 0x422   :  { %v2219_v6 = vpop.f32.mrb[13].mxu1 }
 0x423   :  { %v2220_v7 = vadd.f32 %v2219_v6, %v2218_v4 }
 0x425   :  { %v1696_v8 = vadd.f32 %v2220_v7, %v1730_v5 }
 0x427   :  { %1699 = vst [vmem:[#allocation20] sm:$0xff] %v1696_v8 }
 0x428   :  { %2936 = shalt.err (!%p2933_p8)
}
 0x429   :  { %s2937_s0 = scalar_lea.hbm %s3199_s11, 128 }
 0x42a   :  { %p2938_p9 = scmp.ne.s32.totalorder %s3199_s11, %s2937_s0  ;;  %p2941_p10 = scmp.lt.u32.totalorder %s2937_s0, %s3199_s11 }
 0x42c   :  { %p2943_p11 = pnand %p2941_p10, %p2938_p9 }
 0x42e   :  { %2946 = shalt.err (!%p2943_p11)
}
 0x42f   :  { %1709 = dma.vmem_to_hbm [thread:$0]  %s1707_s19, 128, %s3199_s11, [#allocation4]  }
 0x430   :  { %2959 = dma.done.wait [#allocation4], 128  }
 0x431   :  { %2960 = vsyncadd [#allocation4], 4294967168 }
 0x432   :  { %1713 = vsyncpa [#allocation3], 1 }
 0x433   :  { %1714 = vsyncpa [#allocation6], 1 }
 0x434   :  { %1715 = vsyncpa [#allocation9], 1 }
 0x435   :  { %1716 = vsyncpa [#allocation12], 1 }
 0x436   :  { %1717 = vsyncpa [#allocation15], 1 }
 0x437   :  { %1718 = vsyncpa [#allocation18], 1 }
 0x438   :  { %1719 = vsyncpa [#allocation4], 1 }

</bundles_post_ra>
